<compile_context>
chip_gen: v7x
topology: tpu7x:2x2x1
jax: 0.10.0
libtpu: 0.0.40
codegen_flags: <defaults>
</compile_context>

<pallas_src>
import functools

import jax
import jax.numpy as jnp
from jax.experimental import pallas as pl
from jax.experimental.pallas import tpu as pltpu


def _round_up(x, m):
    return ((x + m - 1) // m) * m


# ----------------------------------------------------------------------------
# Host-side weight packing (done once, outside the hot path)
# ----------------------------------------------------------------------------
# Combined gate/column layout (width 8H), per gate (PyTorch order i,f,g,o) the
# forward column block comes first, then the backward one:
#   [ i_f | i_b | f_f | f_b | g_f | g_b | o_f | o_b ]
def _interleave_cols(w_f, w_b, H):
    parts = []
    for g in range(4):
        parts.append(w_f[..., g * H:(g + 1) * H])
        parts.append(w_b[..., g * H:(g + 1) * H])
    return jnp.concatenate(parts, axis=-1)


def _block_diag_whh(whh_f, whh_b, H):
    """(2H, 8H): rows 0:H (h_f) feed only fwd columns, rows H:2H only bwd."""
    z = jnp.zeros_like(whh_f)
    top = _interleave_cols(whh_f, z, H)
    bot = _interleave_cols(z, whh_b, H)
    return jnp.concatenate([top, bot], axis=0)


def _slab_layout(H, L):
    """Static row offsets of each layer's weights inside the packed bf16 slab."""
    offs = [{"whh": 0}]                       # layer 0 only needs W_hh (its W_ih
    r = _round_up(2 * H, 16)                  #   + bias are folded into emb_proj)
    for l in range(1, L):
        offs.append({"wih": r, "whh": r + 2 * H, "bias": r + 4 * H})
        r += 4 * H + 1
        if l < L - 1:
            r = _round_up(r, 16)              # keep bf16 sublane-tile alignment
    return offs, r


def pack_params(params):
    """One-time repacking: gate-interleaved bf16 weight slab, lane-padded FC
    slab, and an embedding table pre-projected through layer 0's input weights
    (emb(x) @ W_ih == (emb @ W_ih)(x), so the gather commutes)."""
    H = params["layers"][0][0]["w_hh_t"].shape[0]
    L = len(params["layers"])
    C = params["fc_w_t"].shape[1]
    assert H % 8 == 0
    hp = jax.lax.Precision.HIGHEST

    f0, b0 = params["layers"][0]
    wih0 = _interleave_cols(f0["w_ih_t"], b0["w_ih_t"], H)          # (E, 8H)
    bias0 = _interleave_cols(f0["bias"], b0["bias"], H)             # (1, 8H)
    emb_proj = jnp.dot(params["emb"], wih0, precision=hp) + bias0   # (V, 8H) f32
    emb_proj = emb_proj[:, None, :]                                 # (V, 1, 8H)

    offs, rows = _slab_layout(H, L)
    slab = jnp.zeros((rows, 8 * H), jnp.float32)
    slab = slab.at[offs[0]["whh"]:offs[0]["whh"] + 2 * H].set(
        _block_diag_whh(f0["w_hh_t"], b0["w_hh_t"], H))
    for l in range(1, L):
        fl, bl = params["layers"][l]
        o = offs[l]
        slab = slab.at[o["wih"]:o["wih"] + 2 * H].set(
            _interleave_cols(fl["w_ih_t"], bl["w_ih_t"], H))
        slab = slab.at[o["whh"]:o["whh"] + 2 * H].set(
            _block_diag_whh(fl["w_hh_t"], bl["w_hh_t"], H))
        slab = slab.at[o["bias"]:o["bias"] + 1].set(
            _interleave_cols(fl["bias"], bl["bias"], H))

    Cp = _round_up(max(C, 1), 128)                                  # lane-dense output
    fc = jnp.zeros((2 * H + 1, Cp), jnp.float32)
    fc = fc.at[:2 * H, :C].set(params["fc_w_t"])
    fc = fc.at[2 * H, :C].set(params["fc_b"][0])

    return {"emb_proj": emb_proj,
            "lstm_slab": slab.astype(jnp.bfloat16),
            "fc_slab": fc,
            "meta": {"hidden": H, "num_layers": L, "num_classes": C}}


# ----------------------------------------------------------------------------
# Fused Pallas kernel: embedding gather + all LSTM layers (stacked fwd/bwd) + FC
# ----------------------------------------------------------------------------
def _cbet_fused_kernel(ids_ref, emb_ref, w_ref, fc_ref, out_ref, xw_sc, *act_sc,
                       layer_offs, hidden, T, B, Bp, num_layers):
    H = hidden
    G2 = 8 * H                 # both directions' gates, per-gate interleaved
    L = num_layers

    # Hoisted lane masks (reused every step of every layer).
    lane = jax.lax.broadcasted_iota(jnp.int32, (Bp, G2), 1)
    is_g_gate = (lane >= 4 * H) & (lane < 6 * H)      # cell-candidate gates, both dirs
    is_fwd_col = (lane % (2 * H)) < H                 # fwd-direction column blocks

    def cell(gates, c):
        # Single EUP pass: sigmoid(x) = 0.5*(tanh(x/2)+1); g-gates use tanh(x).
        t = jnp.tanh(jnp.where(is_g_gate, gates, 0.5 * gates))
        a = jnp.where(is_g_gate, t, 0.5 * t + 0.5)
        i_g = a[:, 0:2 * H]
        f_g = a[:, 2 * H:4 * H]
        g_g = a[:, 4 * H:6 * H]
        o_g = a[:, 6 * H:8 * H]
        c_new = f_g * c + i_g * g_g
        h_new = o_g * jnp.tanh(c_new)
        return h_new, c_new

    # ---- layer-0 input projection: gather pre-projected embedding rows ------
    if Bp > B:
        # Padded batch rows are never gathered; give them defined (zero) gates.
        xw_sc[...] = jnp.zeros(xw_sc.shape, jnp.float32)
    for t in range(T):
        for b in range(B):
            tok = ids_ref[b * T + t]                  # SMEM scalar
            r = t * Bp + b
            xw_sc[r:r + 1, :] = emb_ref[tok]          # (1, 8H) row, bias pre-folded

    h_f_last = None
    h_b_last = None
    for l in range(L):
        off = layer_offs[l]

        # ---- input projection for layers >= 1: both directions at once ------
        if l > 0:
            wih = w_ref[off["wih"]:off["wih"] + 2 * H, :]                 # bf16
            bias = w_ref[off["bias"]:off["bias"] + 1, :].astype(jnp.float32)
            prev = act_sc[(l - 1) % len(act_sc)]
            xw_sc[...] = (jnp.dot(prev[...].astype(jnp.bfloat16), wih,
                                  preferred_element_type=jnp.float32) + bias)

        whh = w_ref[off["whh"]:off["whh"] + 2 * H, :]                     # bf16 (2H, 8H)
        act_out = act_sc[l % len(act_sc)] if l < L - 1 else None

        # ---- stacked fwd+bwd recurrence: one step advances both directions --
        h = jnp.zeros((Bp, 2 * H), jnp.float32)
        c = jnp.zeros((Bp, 2 * H), jnp.float32)
        h_b_T1 = None
        for s in range(T):                            # static unroll, T is small
            rf = s * Bp                               # fwd consumes timestep s
            rb = (T - 1 - s) * Bp                     # bwd consumes timestep T-1-s
            xw = jnp.where(is_fwd_col,
                           xw_sc[rf:rf + Bp, :], xw_sc[rb:rb + Bp, :])
            if s == 0:
                gates = xw                            # h0 = 0 -> recurrent term is 0
            else:
                gates = xw + jnp.dot(h.astype(jnp.bfloat16), whh,
                                     preferred_element_type=jnp.float32)
            h, c = cell(gates, c)
            if act_out is not None:
                act_out[rf:rf + Bp, 0:H] = h[:, 0:H]           # fwd output at t = s
                act_out[rb:rb + Bp, H:2 * H] = h[:, H:2 * H]   # bwd output at t = T-1-s
            if s == 0:
                h_b_T1 = h[:, H:2 * H]                # bwd output at position T-1
        h_f_last = h[:, 0:H]                          # fwd final hidden (t = T-1)
        h_b_last = h_b_T1

    # ---- fused FC on out[:, -1, :] = [h_f(T-1), h_b(T-1)] -------------------
    fc = fc_ref[...]                                  # (2H+1, Cp) f32
    out_ref[...] = (jnp.dot(h_f_last, fc[0:H, :], preferred_element_type=jnp.float32)
                    + jnp.dot(h_b_last, fc[H:2 * H, :], preferred_element_type=jnp.float32)
                    + fc[2 * H:2 * H + 1, :])


# ----------------------------------------------------------------------------
# Wrapper
# ----------------------------------------------------------------------------
@functools.partial(jax.jit, static_argnames=("hidden", "num_layers", "num_classes"))
def _forward(x_ids, emb_proj, lstm_slab, fc_slab, *, hidden, num_layers, num_classes):
    B, T = x_ids.shape
    H, L, C = hidden, num_layers, num_classes
    Bp = _round_up(B, 8)                              # pad batch to a sublane group
    Cp = fc_slab.shape[1]
    n_slots = min(2, max(L - 1, 0))
    layer_offs, _ = _slab_layout(H, L)

    kernel = functools.partial(_cbet_fused_kernel, layer_offs=tuple(layer_offs),
                               hidden=H, T=T, B=B, Bp=Bp, num_layers=L)

    out = pl.pallas_call(
        kernel,
        out_shape=jax.ShapeDtypeStruct((Bp, Cp), jnp.float32),
        in_specs=[
            pl.BlockSpec(memory_space=pltpu.MemorySpace.SMEM),   # token ids
            pl.BlockSpec(memory_space=pltpu.MemorySpace.VMEM),   # emb @ W_ih_0 + b table
            pl.BlockSpec(memory_space=pltpu.MemorySpace.VMEM),   # packed bf16 LSTM weights
            pl.BlockSpec(memory_space=pltpu.MemorySpace.VMEM),   # FC weights + bias
        ],
        out_specs=pl.BlockSpec(memory_space=pltpu.MemorySpace.VMEM),
        scratch_shapes=[pltpu.VMEM((T * Bp, 8 * H), jnp.float32)]         # gate pre-acts
                       + [pltpu.VMEM((T * Bp, 2 * H), jnp.float32)] * n_slots,  # layer acts
    )(x_ids.reshape(-1).astype(jnp.int32), emb_proj, lstm_slab, fc_slab)
    return out[:B, :C]


def cbet_birnn_forward(packed, x_ids):
    """x_ids: (B, T) int32 token ids -> (B, num_classes) logits."""
    m = packed["meta"]
    return _forward(x_ids, packed["emb_proj"], packed["lstm_slab"],
                    packed["fc_slab"], hidden=m["hidden"],
                    num_layers=m["num_layers"], num_classes=m["num_classes"])


# ----------------------------------------------------------------------------
# Parameter init (deterministic, replaces FasttextLoader / torch init)
# ----------------------------------------------------------------------------
def init_params(key, *, vocab_size, emb_dim, hidden_size, num_layers, num_classes):
    keys = jax.random.split(key, 3 + num_layers * 2 * 3)
    kit = iter(keys)
    params = {
        "emb": 0.1 * jax.random.normal(next(kit), (vocab_size, emb_dim), jnp.float32),
        "layers": [],
        "fc_w_t": jax.random.normal(next(kit), (hidden_size * 2, num_classes),
                                    jnp.float32),             # std=1 like torch init
        "fc_b": 0.01 * jax.random.normal(next(kit), (1, num_classes), jnp.float32),
    }
    for layer in range(num_layers):
        in_dim = emb_dim if layer == 0 else 2 * hidden_size
        dirs = []
        for _d in range(2):  # forward, backward
            scale = 1.0 / jnp.sqrt(hidden_size)
            dirs.append({
                "w_ih_t": scale * jax.random.normal(
                    next(kit), (in_dim, 4 * hidden_size), jnp.float32),
                "w_hh_t": scale * jax.random.normal(
                    next(kit), (hidden_size, 4 * hidden_size), jnp.float32),
                "bias": scale * jax.random.normal(
                    next(kit), (1, 4 * hidden_size), jnp.float32),
            })
        params["layers"].append(dirs)
    return params


# ----------------------------------------------------------------------------
# Pure-JAX reference (full unoptimized bidirectional stack, for correctness)
# ----------------------------------------------------------------------------
def _ref_lstm_dir(x_tbd, w_ih_t, w_hh_t, bias, reverse):
    T, B, _ = x_tbd.shape
    H = w_hh_t.shape[0]
    xs = x_tbd[::-1] if reverse else x_tbd

    def step(carry, x_t):
        h, c = carry
        gates = (jnp.dot(x_t, w_ih_t, precision=jax.lax.Precision.HIGHEST)
                 + jnp.dot(h, w_hh_t, precision=jax.lax.Precision.HIGHEST)
                 + bias[0])
        i = jax.nn.sigmoid(gates[:, :H])
        f = jax.nn.sigmoid(gates[:, H:2 * H])
        g = jnp.tanh(gates[:, 2 * H:3 * H])
        o = jax.nn.sigmoid(gates[:, 3 * H:])
        c = f * c + i * g
        h = o * jnp.tanh(c)
        return (h, c), h

    init = (jnp.zeros((B, H), jnp.float32), jnp.zeros((B, H), jnp.float32))
    _, hs = jax.lax.scan(step, init, xs)
    return hs[::-1] if reverse else hs


def ref_forward(params, x_ids):
    emb = jnp.take(params["emb"], x_ids, axis=0)
    h = jnp.transpose(emb, (1, 0, 2)).astype(jnp.float32)
    for dirs in params["layers"]:
        out_f = _ref_lstm_dir(h, dirs[0]["w_ih_t"], dirs[0]["w_hh_t"],
                              dirs[0]["bias"], reverse=False)
        out_b = _ref_lstm_dir(h, dirs[1]["w_ih_t"], dirs[1]["w_hh_t"],
                              dirs[1]["bias"], reverse=True)
        h = jnp.concatenate([out_f, out_b], axis=-1)
    last = h[-1]
    return (jnp.dot(last, params["fc_w_t"], precision=jax.lax.Precision.HIGHEST)
            + params["fc_b"])


# ----------------------------------------------------------------------------
if __name__ == "__main__":
    B, T = 2, 8
    VOCAB, EMB_DIM = 50, 32
    HIDDEN, NUM_LAYERS, NUM_CLASSES = 32, 2, 9

    key = jax.random.PRNGKey(0)
    k_param, k_ids = jax.random.split(key)
    params = init_params(k_param, vocab_size=VOCAB, emb_dim=EMB_DIM,
                         hidden_size=HIDDEN, num_layers=NUM_LAYERS,
                         num_classes=NUM_CLASSES)
    x_ids = jax.random.randint(k_ids, (B, T), 0, VOCAB, dtype=jnp.int32)

    packed = pack_params(params)      # one-time host-side weight repacking
    logits = cbet_birnn_forward(packed, x_ids)
    logits = jax.block_until_ready(logits)

    ref = jax.block_until_ready(ref_forward(params, x_ids))
    assert logits.shape == (B, NUM_CLASSES), logits.shape
    # bf16 MXU operands in the recurrent/projection matmuls vs. a f32 HIGHEST
    # reference -> slightly looser tolerance than pure-f32.
    assert jnp.allclose(logits, ref, atol=5e-2, rtol=5e-2), (logits, ref)

    print("KERNEL_OK")
</pallas_src>

<mosaic_0001>
module attributes {stable_mosaic.version = 11 : i64} {
  func.func @_cbet_fused_kernel(%arg0: memref<16xi32, #tpu.memory_space<smem>>, %arg1: memref<50x1x256xf32, #tpu.memory_space<vmem>>, %arg2: memref<193x256xbf16, #tpu.memory_space<vmem>>, %arg3: memref<65x128xf32, #tpu.memory_space<vmem>>, %arg4: memref<8x128xf32, #tpu.memory_space<vmem>>, %arg5: memref<64x256xf32, #tpu.memory_space<vmem>>, %arg6: memref<64x64xf32, #tpu.memory_space<vmem>>) attributes {dimension_semantics = [], scalar_prefetch = 0 : i64, scratch_operands = 2 : i64, tpu.core_type = #tpu.core_type<tc>} {
    %0 = tpu.iota {dimensions = array<i32: 1>} : vector<8x256xi32>
    %c128_i32 = arith.constant 128 : i32
    %1 = vector.broadcast %c128_i32 : i32 to vector<8x256xi32>
    %2 = arith.cmpi sge, %0, %1 : vector<8x256xi32>
    %c192_i32 = arith.constant 192 : i32
    %3 = vector.broadcast %c192_i32 : i32 to vector<8x256xi32>
    %4 = arith.cmpi slt, %0, %3 : vector<8x256xi32>
    %5 = arith.andi %2, %4 : vector<8x256xi1>
    %c64_i32 = arith.constant 64 : i32
    %c0_i32 = arith.constant 0 : i32
    %6 = arith.cmpi eq, %c64_i32, %c0_i32 : i32
    %c1_i32 = arith.constant 1 : i32
    %7 = arith.select %6, %c1_i32, %c64_i32 : i32
    %8 = vector.broadcast %7 : i32 to vector<8x256xi32>
    %9 = arith.remsi %0, %8 : vector<8x256xi32>
    %c0_i32_0 = arith.constant 0 : i32
    %10 = vector.broadcast %c0_i32_0 : i32 to vector<8x256xi32>
    %11 = arith.cmpi ne, %9, %10 : vector<8x256xi32>
    %c0_i32_1 = arith.constant 0 : i32
    %12 = vector.broadcast %c0_i32_1 : i32 to vector<8x256xi32>
    %13 = arith.cmpi slt, %9, %12 : vector<8x256xi32>
    %c0_i32_2 = arith.constant 0 : i32
    %14 = arith.cmpi slt, %7, %c0_i32_2 : i32
    %15 = vector.broadcast %14 : i1 to vector<8x256xi1>
    %16 = vector.broadcast %15 : vector<8x256xi1> to vector<8x256xi1>
    %17 = arith.xori %13, %16 : vector<8x256xi1>
    %18 = arith.andi %17, %11 : vector<8x256xi1>
    %19 = vector.broadcast %7 : i32 to vector<8x256xi32>
    %20 = arith.addi %9, %19 : vector<8x256xi32>
    %21 = arith.select %18, %20, %9 : vector<8x256xi1>, vector<8x256xi32>
    %c32_i32 = arith.constant 32 : i32
    %22 = vector.broadcast %c32_i32 : i32 to vector<8x256xi32>
    %23 = arith.cmpi slt, %21, %22 : vector<8x256xi32>
    %cst = arith.constant 0.000000e+00 : f32
    %24 = vector.broadcast %cst : f32 to vector<64x256xf32>
    %c0 = arith.constant 0 : index
    %c0_3 = arith.constant 0 : index
    %25 = vector.load %arg5[%c0, %c0_3] : memref<64x256xf32, #tpu.memory_space<vmem>>, vector<64x256xf32>
    tpu.vector_store %arg5[%c0, %c0_3], %24 {strides = array<i32>} : memref<64x256xf32, #tpu.memory_space<vmem>>, vector<64x256xf32>,
    %c0_4 = arith.constant 0 : index
    %26 = memref.load %arg0[%c0_4] : memref<16xi32, #tpu.memory_space<smem>>
    %27 = arith.index_cast %26 : i32 to index
    %c0_5 = arith.constant 0 : index
    %c0_6 = arith.constant 0 : index
    %28 = vector.load %arg1[%27, %c0_5, %c0_6] : memref<50x1x256xf32, #tpu.memory_space<vmem>>, vector<1x1x256xf32>
    %29 = vector.shape_cast %28 : vector<1x1x256xf32> to vector<1x256xf32>
    %c0_7 = arith.constant 0 : index
    %c0_8 = arith.constant 0 : index
    %30 = vector.load %arg5[%c0_7, %c0_8] : memref<64x256xf32, #tpu.memory_space<vmem>>, vector<1x256xf32>
    tpu.vector_store %arg5[%c0_7, %c0_8], %29 {strides = array<i32>} : memref<64x256xf32, #tpu.memory_space<vmem>>, vector<1x256xf32>,
    %c8 = arith.constant 8 : index
    %31 = memref.load %arg0[%c8] : memref<16xi32, #tpu.memory_space<smem>>
    %32 = arith.index_cast %31 : i32 to index
    %c0_9 = arith.constant 0 : index
    %c0_10 = arith.constant 0 : index
    %33 = vector.load %arg1[%32, %c0_9, %c0_10] : memref<50x1x256xf32, #tpu.memory_space<vmem>>, vector<1x1x256xf32>
    %34 = vector.shape_cast %33 : vector<1x1x256xf32> to vector<1x256xf32>
    %c1 = arith.constant 1 : index
    %c0_11 = arith.constant 0 : index
    %35 = vector.load %arg5[%c1, %c0_11] : memref<64x256xf32, #tpu.memory_space<vmem>>, vector<1x256xf32>
    tpu.vector_store %arg5[%c1, %c0_11], %34 {strides = array<i32>} : memref<64x256xf32, #tpu.memory_space<vmem>>, vector<1x256xf32>,
    %c1_12 = arith.constant 1 : index
    %36 = memref.load %arg0[%c1_12] : memref<16xi32, #tpu.memory_space<smem>>
    %37 = arith.index_cast %36 : i32 to index
    %c0_13 = arith.constant 0 : index
    %c0_14 = arith.constant 0 : index
    %38 = vector.load %arg1[%37, %c0_13, %c0_14] : memref<50x1x256xf32, #tpu.memory_space<vmem>>, vector<1x1x256xf32>
    %39 = vector.shape_cast %38 : vector<1x1x256xf32> to vector<1x256xf32>
    %c8_15 = arith.constant 8 : index
    %c0_16 = arith.constant 0 : index
    %40 = vector.load %arg5[%c8_15, %c0_16] : memref<64x256xf32, #tpu.memory_space<vmem>>, vector<1x256xf32>
    tpu.vector_store %arg5[%c8_15, %c0_16], %39 {strides = array<i32>} : memref<64x256xf32, #tpu.memory_space<vmem>>, vector<1x256xf32>,
    %c9 = arith.constant 9 : index
    %41 = memref.load %arg0[%c9] : memref<16xi32, #tpu.memory_space<smem>>
    %42 = arith.index_cast %41 : i32 to index
    %c0_17 = arith.constant 0 : index
    %c0_18 = arith.constant 0 : index
    %43 = vector.load %arg1[%42, %c0_17, %c0_18] : memref<50x1x256xf32, #tpu.memory_space<vmem>>, vector<1x1x256xf32>
    %44 = vector.shape_cast %43 : vector<1x1x256xf32> to vector<1x256xf32>
    %c9_19 = arith.constant 9 : index
    %c0_20 = arith.constant 0 : index
    %45 = vector.load %arg5[%c9_19, %c0_20] : memref<64x256xf32, #tpu.memory_space<vmem>>, vector<1x256xf32>
    tpu.vector_store %arg5[%c9_19, %c0_20], %44 {strides = array<i32>} : memref<64x256xf32, #tpu.memory_space<vmem>>, vector<1x256xf32>,
    %c2 = arith.constant 2 : index
    %46 = memref.load %arg0[%c2] : memref<16xi32, #tpu.memory_space<smem>>
    %47 = arith.index_cast %46 : i32 to index
    %c0_21 = arith.constant 0 : index
    %c0_22 = arith.constant 0 : index
    %48 = vector.load %arg1[%47, %c0_21, %c0_22] : memref<50x1x256xf32, #tpu.memory_space<vmem>>, vector<1x1x256xf32>
    %49 = vector.shape_cast %48 : vector<1x1x256xf32> to vector<1x256xf32>
    %c16 = arith.constant 16 : index
    %c0_23 = arith.constant 0 : index
    %50 = vector.load %arg5[%c16, %c0_23] : memref<64x256xf32, #tpu.memory_space<vmem>>, vector<1x256xf32>
    tpu.vector_store %arg5[%c16, %c0_23], %49 {strides = array<i32>} : memref<64x256xf32, #tpu.memory_space<vmem>>, vector<1x256xf32>,
    %c10 = arith.constant 10 : index
    %51 = memref.load %arg0[%c10] : memref<16xi32, #tpu.memory_space<smem>>
    %52 = arith.index_cast %51 : i32 to index
    %c0_24 = arith.constant 0 : index
    %c0_25 = arith.constant 0 : index
    %53 = vector.load %arg1[%52, %c0_24, %c0_25] : memref<50x1x256xf32, #tpu.memory_space<vmem>>, vector<1x1x256xf32>
    %54 = vector.shape_cast %53 : vector<1x1x256xf32> to vector<1x256xf32>
    %c17 = arith.constant 17 : index
    %c0_26 = arith.constant 0 : index
    %55 = vector.load %arg5[%c17, %c0_26] : memref<64x256xf32, #tpu.memory_space<vmem>>, vector<1x256xf32>
    tpu.vector_store %arg5[%c17, %c0_26], %54 {strides = array<i32>} : memref<64x256xf32, #tpu.memory_space<vmem>>, vector<1x256xf32>,
    %c3 = arith.constant 3 : index
    %56 = memref.load %arg0[%c3] : memref<16xi32, #tpu.memory_space<smem>>
    %57 = arith.index_cast %56 : i32 to index
    %c0_27 = arith.constant 0 : index
    %c0_28 = arith.constant 0 : index
    %58 = vector.load %arg1[%57, %c0_27, %c0_28] : memref<50x1x256xf32, #tpu.memory_space<vmem>>, vector<1x1x256xf32>
    %59 = vector.shape_cast %58 : vector<1x1x256xf32> to vector<1x256xf32>
    %c24 = arith.constant 24 : index
    %c0_29 = arith.constant 0 : index
    %60 = vector.load %arg5[%c24, %c0_29] : memref<64x256xf32, #tpu.memory_space<vmem>>, vector<1x256xf32>
    tpu.vector_store %arg5[%c24, %c0_29], %59 {strides = array<i32>} : memref<64x256xf32, #tpu.memory_space<vmem>>, vector<1x256xf32>,
    %c11 = arith.constant 11 : index
    %61 = memref.load %arg0[%c11] : memref<16xi32, #tpu.memory_space<smem>>
    %62 = arith.index_cast %61 : i32 to index
    %c0_30 = arith.constant 0 : index
    %c0_31 = arith.constant 0 : index
    %63 = vector.load %arg1[%62, %c0_30, %c0_31] : memref<50x1x256xf32, #tpu.memory_space<vmem>>, vector<1x1x256xf32>
    %64 = vector.shape_cast %63 : vector<1x1x256xf32> to vector<1x256xf32>
    %c25 = arith.constant 25 : index
    %c0_32 = arith.constant 0 : index
    %65 = vector.load %arg5[%c25, %c0_32] : memref<64x256xf32, #tpu.memory_space<vmem>>, vector<1x256xf32>
    tpu.vector_store %arg5[%c25, %c0_32], %64 {strides = array<i32>} : memref<64x256xf32, #tpu.memory_space<vmem>>, vector<1x256xf32>,
    %c4 = arith.constant 4 : index
    %66 = memref.load %arg0[%c4] : memref<16xi32, #tpu.memory_space<smem>>
    %67 = arith.index_cast %66 : i32 to index
    %c0_33 = arith.constant 0 : index
    %c0_34 = arith.constant 0 : index
    %68 = vector.load %arg1[%67, %c0_33, %c0_34] : memref<50x1x256xf32, #tpu.memory_space<vmem>>, vector<1x1x256xf32>
    %69 = vector.shape_cast %68 : vector<1x1x256xf32> to vector<1x256xf32>
    %c32 = arith.constant 32 : index
    %c0_35 = arith.constant 0 : index
    %70 = vector.load %arg5[%c32, %c0_35] : memref<64x256xf32, #tpu.memory_space<vmem>>, vector<1x256xf32>
    tpu.vector_store %arg5[%c32, %c0_35], %69 {strides = array<i32>} : memref<64x256xf32, #tpu.memory_space<vmem>>, vector<1x256xf32>,
    %c12 = arith.constant 12 : index
    %71 = memref.load %arg0[%c12] : memref<16xi32, #tpu.memory_space<smem>>
    %72 = arith.index_cast %71 : i32 to index
    %c0_36 = arith.constant 0 : index
    %c0_37 = arith.constant 0 : index
    %73 = vector.load %arg1[%72, %c0_36, %c0_37] : memref<50x1x256xf32, #tpu.memory_space<vmem>>, vector<1x1x256xf32>
    %74 = vector.shape_cast %73 : vector<1x1x256xf32> to vector<1x256xf32>
    %c33 = arith.constant 33 : index
    %c0_38 = arith.constant 0 : index
    %75 = vector.load %arg5[%c33, %c0_38] : memref<64x256xf32, #tpu.memory_space<vmem>>, vector<1x256xf32>
    tpu.vector_store %arg5[%c33, %c0_38], %74 {strides = array<i32>} : memref<64x256xf32, #tpu.memory_space<vmem>>, vector<1x256xf32>,
    %c5 = arith.constant 5 : index
    %76 = memref.load %arg0[%c5] : memref<16xi32, #tpu.memory_space<smem>>
    %77 = arith.index_cast %76 : i32 to index
    %c0_39 = arith.constant 0 : index
    %c0_40 = arith.constant 0 : index
    %78 = vector.load %arg1[%77, %c0_39, %c0_40] : memref<50x1x256xf32, #tpu.memory_space<vmem>>, vector<1x1x256xf32>
    %79 = vector.shape_cast %78 : vector<1x1x256xf32> to vector<1x256xf32>
    %c40 = arith.constant 40 : index
    %c0_41 = arith.constant 0 : index
    %80 = vector.load %arg5[%c40, %c0_41] : memref<64x256xf32, #tpu.memory_space<vmem>>, vector<1x256xf32>
    tpu.vector_store %arg5[%c40, %c0_41], %79 {strides = array<i32>} : memref<64x256xf32, #tpu.memory_space<vmem>>, vector<1x256xf32>,
    %c13 = arith.constant 13 : index
    %81 = memref.load %arg0[%c13] : memref<16xi32, #tpu.memory_space<smem>>
    %82 = arith.index_cast %81 : i32 to index
    %c0_42 = arith.constant 0 : index
    %c0_43 = arith.constant 0 : index
    %83 = vector.load %arg1[%82, %c0_42, %c0_43] : memref<50x1x256xf32, #tpu.memory_space<vmem>>, vector<1x1x256xf32>
    %84 = vector.shape_cast %83 : vector<1x1x256xf32> to vector<1x256xf32>
    %c41 = arith.constant 41 : index
    %c0_44 = arith.constant 0 : index
    %85 = vector.load %arg5[%c41, %c0_44] : memref<64x256xf32, #tpu.memory_space<vmem>>, vector<1x256xf32>
    tpu.vector_store %arg5[%c41, %c0_44], %84 {strides = array<i32>} : memref<64x256xf32, #tpu.memory_space<vmem>>, vector<1x256xf32>,
    %c6 = arith.constant 6 : index
    %86 = memref.load %arg0[%c6] : memref<16xi32, #tpu.memory_space<smem>>
    %87 = arith.index_cast %86 : i32 to index
    %c0_45 = arith.constant 0 : index
    %c0_46 = arith.constant 0 : index
    %88 = vector.load %arg1[%87, %c0_45, %c0_46] : memref<50x1x256xf32, #tpu.memory_space<vmem>>, vector<1x1x256xf32>
    %89 = vector.shape_cast %88 : vector<1x1x256xf32> to vector<1x256xf32>
    %c48 = arith.constant 48 : index
    %c0_47 = arith.constant 0 : index
    %90 = vector.load %arg5[%c48, %c0_47] : memref<64x256xf32, #tpu.memory_space<vmem>>, vector<1x256xf32>
    tpu.vector_store %arg5[%c48, %c0_47], %89 {strides = array<i32>} : memref<64x256xf32, #tpu.memory_space<vmem>>, vector<1x256xf32>,
    %c14 = arith.constant 14 : index
    %91 = memref.load %arg0[%c14] : memref<16xi32, #tpu.memory_space<smem>>
    %92 = arith.index_cast %91 : i32 to index
    %c0_48 = arith.constant 0 : index
    %c0_49 = arith.constant 0 : index
    %93 = vector.load %arg1[%92, %c0_48, %c0_49] : memref<50x1x256xf32, #tpu.memory_space<vmem>>, vector<1x1x256xf32>
    %94 = vector.shape_cast %93 : vector<1x1x256xf32> to vector<1x256xf32>
    %c49 = arith.constant 49 : index
    %c0_50 = arith.constant 0 : index
    %95 = vector.load %arg5[%c49, %c0_50] : memref<64x256xf32, #tpu.memory_space<vmem>>, vector<1x256xf32>
    tpu.vector_store %arg5[%c49, %c0_50], %94 {strides = array<i32>} : memref<64x256xf32, #tpu.memory_space<vmem>>, vector<1x256xf32>,
    %c7 = arith.constant 7 : index
    %96 = memref.load %arg0[%c7] : memref<16xi32, #tpu.memory_space<smem>>
    %97 = arith.index_cast %96 : i32 to index
    %c0_51 = arith.constant 0 : index
    %c0_52 = arith.constant 0 : index
    %98 = vector.load %arg1[%97, %c0_51, %c0_52] : memref<50x1x256xf32, #tpu.memory_space<vmem>>, vector<1x1x256xf32>
    %99 = vector.shape_cast %98 : vector<1x1x256xf32> to vector<1x256xf32>
    %c56 = arith.constant 56 : index
    %c0_53 = arith.constant 0 : index
    %100 = vector.load %arg5[%c56, %c0_53] : memref<64x256xf32, #tpu.memory_space<vmem>>, vector<1x256xf32>
    tpu.vector_store %arg5[%c56, %c0_53], %99 {strides = array<i32>} : memref<64x256xf32, #tpu.memory_space<vmem>>, vector<1x256xf32>,
    %c15 = arith.constant 15 : index
    %101 = memref.load %arg0[%c15] : memref<16xi32, #tpu.memory_space<smem>>
    %102 = arith.index_cast %101 : i32 to index
    %c0_54 = arith.constant 0 : index
    %c0_55 = arith.constant 0 : index
    %103 = vector.load %arg1[%102, %c0_54, %c0_55] : memref<50x1x256xf32, #tpu.memory_space<vmem>>, vector<1x1x256xf32>
    %104 = vector.shape_cast %103 : vector<1x1x256xf32> to vector<1x256xf32>
    %c57 = arith.constant 57 : index
    %c0_56 = arith.constant 0 : index
    %105 = vector.load %arg5[%c57, %c0_56] : memref<64x256xf32, #tpu.memory_space<vmem>>, vector<1x256xf32>
    tpu.vector_store %arg5[%c57, %c0_56], %104 {strides = array<i32>} : memref<64x256xf32, #tpu.memory_space<vmem>>, vector<1x256xf32>,
    %c0_57 = arith.constant 0 : index
    %c0_58 = arith.constant 0 : index
    %106 = vector.load %arg2[%c0_57, %c0_58] : memref<193x256xbf16, #tpu.memory_space<vmem>>, vector<64x256xbf16>
    %cst_59 = arith.constant 0.000000e+00 : f32
    %107 = vector.broadcast %cst_59 : f32 to vector<8x64xf32>
    %c0_60 = arith.constant 0 : index
    %c0_61 = arith.constant 0 : index
    %108 = vector.load %arg5[%c0_60, %c0_61] : memref<64x256xf32, #tpu.memory_space<vmem>>, vector<8x256xf32>
    %c56_62 = arith.constant 56 : index
    %c0_63 = arith.constant 0 : index
    %109 = vector.load %arg5[%c56_62, %c0_63] : memref<64x256xf32, #tpu.memory_space<vmem>>, vector<8x256xf32>
    %110 = arith.select %23, %108, %109 : vector<8x256xi1>, vector<8x256xf32>
    %cst_64 = arith.constant 5.000000e-01 : f32
    %111 = vector.broadcast %cst_64 : f32 to vector<8x256xf32>
    %112 = arith.mulf %111, %110 : vector<8x256xf32>
    %113 = arith.select %5, %110, %112 : vector<8x256xi1>, vector<8x256xf32>
    %114 = math.tanh %113 : vector<8x256xf32>
    %cst_65 = arith.constant 5.000000e-01 : f32
    %115 = vector.broadcast %cst_65 : f32 to vector<8x256xf32>
    %116 = arith.mulf %115, %114 : vector<8x256xf32>
    %cst_66 = arith.constant 5.000000e-01 : f32
    %117 = vector.broadcast %cst_66 : f32 to vector<8x256xf32>
    %118 = arith.addf %116, %117 : vector<8x256xf32>
    %119 = arith.select %5, %114, %118 : vector<8x256xi1>, vector<8x256xf32>
    %120 = vector.extract_strided_slice %119 {offsets = [0, 0], sizes = [8, 64], strides = [1, 1]} : vector<8x256xf32> to vector<8x64xf32>
    %121 = vector.extract_strided_slice %119 {offsets = [0, 64], sizes = [8, 64], strides = [1, 1]} : vector<8x256xf32> to vector<8x64xf32>
    %122 = vector.extract_strided_slice %119 {offsets = [0, 128], sizes = [8, 64], strides = [1, 1]} : vector<8x256xf32> to vector<8x64xf32>
    %123 = vector.extract_strided_slice %119 {offsets = [0, 192], sizes = [8, 64], strides = [1, 1]} : vector<8x256xf32> to vector<8x64xf32>
    %124 = arith.mulf %121, %107 : vector<8x64xf32>
    %125 = arith.mulf %120, %122 : vector<8x64xf32>
    %126 = arith.addf %124, %125 : vector<8x64xf32>
    %127 = math.tanh %126 : vector<8x64xf32>
    %128 = arith.mulf %123, %127 : vector<8x64xf32>
    %129 = vector.extract_strided_slice %128 {offsets = [0, 0], sizes = [8, 32], strides = [1, 1]} : vector<8x64xf32> to vector<8x32xf32>
    %c0_67 = arith.constant 0 : index
    %c0_68 = arith.constant 0 : index
    %130 = vector.load %arg6[%c0_67, %c0_68] : memref<64x64xf32, #tpu.memory_space<vmem>>, vector<8x32xf32>
    tpu.vector_store %arg6[%c0_67, %c0_68], %129 {strides = array<i32>} : memref<64x64xf32, #tpu.memory_space<vmem>>, vector<8x32xf32>,
    %131 = vector.extract_strided_slice %128 {offsets = [0, 32], sizes = [8, 32], strides = [1, 1]} : vector<8x64xf32> to vector<8x32xf32>
    %c56_69 = arith.constant 56 : index
    %c32_70 = arith.constant 32 : index
    %132 = vector.load %arg6[%c56_69, %c32_70] : memref<64x64xf32, #tpu.memory_space<vmem>>, vector<8x32xf32>
    tpu.vector_store %arg6[%c56_69, %c32_70], %131 {strides = array<i32>} : memref<64x64xf32, #tpu.memory_space<vmem>>, vector<8x32xf32>,
    %c8_71 = arith.constant 8 : index
    %c0_72 = arith.constant 0 : index
    %133 = vector.load %arg5[%c8_71, %c0_72] : memref<64x256xf32, #tpu.memory_space<vmem>>, vector<8x256xf32>
    %c48_73 = arith.constant 48 : index
    %c0_74 = arith.constant 0 : index
    %134 = vector.load %arg5[%c48_73, %c0_74] : memref<64x256xf32, #tpu.memory_space<vmem>>, vector<8x256xf32>
    %135 = arith.select %23, %133, %134 : vector<8x256xi1>, vector<8x256xf32>
    %136 = arith.truncf %128 : vector<8x64xf32> to vector<8x64xbf16>
    %cst_75 = arith.constant dense<0.000000e+00> : vector<8x256xf32>
    %137 = tpu.matmul %136, %106, %cst_75 {dimension_numbers = #tpu.dot_dimension_numbers<[1], [0], [0], [1], [0, 0, 1, 1], [], []>} : vector<8x64xbf16>, vector<64x256xbf16>, vector<8x256xf32> -> vector<8x256xf32>
    %138 = arith.addf %135, %137 : vector<8x256xf32>
    %cst_76 = arith.constant 5.000000e-01 : f32
    %139 = vector.broadcast %cst_76 : f32 to vector<8x256xf32>
    %140 = arith.mulf %139, %138 : vector<8x256xf32>
    %141 = arith.select %5, %138, %140 : vector<8x256xi1>, vector<8x256xf32>
    %142 = math.tanh %141 : vector<8x256xf32>
    %cst_77 = arith.constant 5.000000e-01 : f32
    %143 = vector.broadcast %cst_77 : f32 to vector<8x256xf32>
    %144 = arith.mulf %143, %142 : vector<8x256xf32>
    %cst_78 = arith.constant 5.000000e-01 : f32
    %145 = vector.broadcast %cst_78 : f32 to vector<8x256xf32>
    %146 = arith.addf %144, %145 : vector<8x256xf32>
    %147 = arith.select %5, %142, %146 : vector<8x256xi1>, vector<8x256xf32>
    %148 = vector.extract_strided_slice %147 {offsets = [0, 0], sizes = [8, 64], strides = [1, 1]} : vector<8x256xf32> to vector<8x64xf32>
    %149 = vector.extract_strided_slice %147 {offsets = [0, 64], sizes = [8, 64], strides = [1, 1]} : vector<8x256xf32> to vector<8x64xf32>
    %150 = vector.extract_strided_slice %147 {offsets = [0, 128], sizes = [8, 64], strides = [1, 1]} : vector<8x256xf32> to vector<8x64xf32>
    %151 = vector.extract_strided_slice %147 {offsets = [0, 192], sizes = [8, 64], strides = [1, 1]} : vector<8x256xf32> to vector<8x64xf32>
    %152 = arith.mulf %149, %126 : vector<8x64xf32>
    %153 = arith.mulf %148, %150 : vector<8x64xf32>
    %154 = arith.addf %152, %153 : vector<8x64xf32>
    %155 = math.tanh %154 : vector<8x64xf32>
    %156 = arith.mulf %151, %155 : vector<8x64xf32>
    %157 = vector.extract_strided_slice %156 {offsets = [0, 0], sizes = [8, 32], strides = [1, 1]} : vector<8x64xf32> to vector<8x32xf32>
    %c8_79 = arith.constant 8 : index
    %c0_80 = arith.constant 0 : index
    %158 = vector.load %arg6[%c8_79, %c0_80] : memref<64x64xf32, #tpu.memory_space<vmem>>, vector<8x32xf32>
    tpu.vector_store %arg6[%c8_79, %c0_80], %157 {strides = array<i32>} : memref<64x64xf32, #tpu.memory_space<vmem>>, vector<8x32xf32>,
    %159 = vector.extract_strided_slice %156 {offsets = [0, 32], sizes = [8, 32], strides = [1, 1]} : vector<8x64xf32> to vector<8x32xf32>
    %c48_81 = arith.constant 48 : index
    %c32_82 = arith.constant 32 : index
    %160 = vector.load %arg6[%c48_81, %c32_82] : memref<64x64xf32, #tpu.memory_space<vmem>>, vector<8x32xf32>
    tpu.vector_store %arg6[%c48_81, %c32_82], %159 {strides = array<i32>} : memref<64x64xf32, #tpu.memory_space<vmem>>, vector<8x32xf32>,
    %c16_83 = arith.constant 16 : index
    %c0_84 = arith.constant 0 : index
    %161 = vector.load %arg5[%c16_83, %c0_84] : memref<64x256xf32, #tpu.memory_space<vmem>>, vector<8x256xf32>
    %c40_85 = arith.constant 40 : index
    %c0_86 = arith.constant 0 : index
    %162 = vector.load %arg5[%c40_85, %c0_86] : memref<64x256xf32, #tpu.memory_space<vmem>>, vector<8x256xf32>
    %163 = arith.select %23, %161, %162 : vector<8x256xi1>, vector<8x256xf32>
    %164 = arith.truncf %156 : vector<8x64xf32> to vector<8x64xbf16>
    %cst_87 = arith.constant dense<0.000000e+00> : vector<8x256xf32>
    %165 = tpu.matmul %164, %106, %cst_87 {dimension_numbers = #tpu.dot_dimension_numbers<[1], [0], [0], [1], [0, 0, 1, 1], [], []>} : vector<8x64xbf16>, vector<64x256xbf16>, vector<8x256xf32> -> vector<8x256xf32>
    %166 = arith.addf %163, %165 : vector<8x256xf32>
    %cst_88 = arith.constant 5.000000e-01 : f32
    %167 = vector.broadcast %cst_88 : f32 to vector<8x256xf32>
    %168 = arith.mulf %167, %166 : vector<8x256xf32>
    %169 = arith.select %5, %166, %168 : vector<8x256xi1>, vector<8x256xf32>
    %170 = math.tanh %169 : vector<8x256xf32>
    %cst_89 = arith.constant 5.000000e-01 : f32
    %171 = vector.broadcast %cst_89 : f32 to vector<8x256xf32>
    %172 = arith.mulf %171, %170 : vector<8x256xf32>
    %cst_90 = arith.constant 5.000000e-01 : f32
    %173 = vector.broadcast %cst_90 : f32 to vector<8x256xf32>
    %174 = arith.addf %172, %173 : vector<8x256xf32>
    %175 = arith.select %5, %170, %174 : vector<8x256xi1>, vector<8x256xf32>
    %176 = vector.extract_strided_slice %175 {offsets = [0, 0], sizes = [8, 64], strides = [1, 1]} : vector<8x256xf32> to vector<8x64xf32>
    %177 = vector.extract_strided_slice %175 {offsets = [0, 64], sizes = [8, 64], strides = [1, 1]} : vector<8x256xf32> to vector<8x64xf32>
    %178 = vector.extract_strided_slice %175 {offsets = [0, 128], sizes = [8, 64], strides = [1, 1]} : vector<8x256xf32> to vector<8x64xf32>
    %179 = vector.extract_strided_slice %175 {offsets = [0, 192], sizes = [8, 64], strides = [1, 1]} : vector<8x256xf32> to vector<8x64xf32>
    %180 = arith.mulf %177, %154 : vector<8x64xf32>
    %181 = arith.mulf %176, %178 : vector<8x64xf32>
    %182 = arith.addf %180, %181 : vector<8x64xf32>
    %183 = math.tanh %182 : vector<8x64xf32>
    %184 = arith.mulf %179, %183 : vector<8x64xf32>
    %185 = vector.extract_strided_slice %184 {offsets = [0, 0], sizes = [8, 32], strides = [1, 1]} : vector<8x64xf32> to vector<8x32xf32>
    %c16_91 = arith.constant 16 : index
    %c0_92 = arith.constant 0 : index
    %186 = vector.load %arg6[%c16_91, %c0_92] : memref<64x64xf32, #tpu.memory_space<vmem>>, vector<8x32xf32>
    tpu.vector_store %arg6[%c16_91, %c0_92], %185 {strides = array<i32>} : memref<64x64xf32, #tpu.memory_space<vmem>>, vector<8x32xf32>,
    %187 = vector.extract_strided_slice %184 {offsets = [0, 32], sizes = [8, 32], strides = [1, 1]} : vector<8x64xf32> to vector<8x32xf32>
    %c40_93 = arith.constant 40 : index
    %c32_94 = arith.constant 32 : index
    %188 = vector.load %arg6[%c40_93, %c32_94] : memref<64x64xf32, #tpu.memory_space<vmem>>, vector<8x32xf32>
    tpu.vector_store %arg6[%c40_93, %c32_94], %187 {strides = array<i32>} : memref<64x64xf32, #tpu.memory_space<vmem>>, vector<8x32xf32>,
    %c24_95 = arith.constant 24 : index
    %c0_96 = arith.constant 0 : index
    %189 = vector.load %arg5[%c24_95, %c0_96] : memref<64x256xf32, #tpu.memory_space<vmem>>, vector<8x256xf32>
    %c32_97 = arith.constant 32 : index
    %c0_98 = arith.constant 0 : index
    %190 = vector.load %arg5[%c32_97, %c0_98] : memref<64x256xf32, #tpu.memory_space<vmem>>, vector<8x256xf32>
    %191 = arith.select %23, %189, %190 : vector<8x256xi1>, vector<8x256xf32>
    %192 = arith.truncf %184 : vector<8x64xf32> to vector<8x64xbf16>
    %cst_99 = arith.constant dense<0.000000e+00> : vector<8x256xf32>
    %193 = tpu.matmul %192, %106, %cst_99 {dimension_numbers = #tpu.dot_dimension_numbers<[1], [0], [0], [1], [0, 0, 1, 1], [], []>} : vector<8x64xbf16>, vector<64x256xbf16>, vector<8x256xf32> -> vector<8x256xf32>
    %194 = arith.addf %191, %193 : vector<8x256xf32>
    %cst_100 = arith.constant 5.000000e-01 : f32
    %195 = vector.broadcast %cst_100 : f32 to vector<8x256xf32>
    %196 = arith.mulf %195, %194 : vector<8x256xf32>
    %197 = arith.select %5, %194, %196 : vector<8x256xi1>, vector<8x256xf32>
    %198 = math.tanh %197 : vector<8x256xf32>
    %cst_101 = arith.constant 5.000000e-01 : f32
    %199 = vector.broadcast %cst_101 : f32 to vector<8x256xf32>
    %200 = arith.mulf %199, %198 : vector<8x256xf32>
    %cst_102 = arith.constant 5.000000e-01 : f32
    %201 = vector.broadcast %cst_102 : f32 to vector<8x256xf32>
    %202 = arith.addf %200, %201 : vector<8x256xf32>
    %203 = arith.select %5, %198, %202 : vector<8x256xi1>, vector<8x256xf32>
    %204 = vector.extract_strided_slice %203 {offsets = [0, 0], sizes = [8, 64], strides = [1, 1]} : vector<8x256xf32> to vector<8x64xf32>
    %205 = vector.extract_strided_slice %203 {offsets = [0, 64], sizes = [8, 64], strides = [1, 1]} : vector<8x256xf32> to vector<8x64xf32>
    %206 = vector.extract_strided_slice %203 {offsets = [0, 128], sizes = [8, 64], strides = [1, 1]} : vector<8x256xf32> to vector<8x64xf32>
    %207 = vector.extract_strided_slice %203 {offsets = [0, 192], sizes = [8, 64], strides = [1, 1]} : vector<8x256xf32> to vector<8x64xf32>
    %208 = arith.mulf %205, %182 : vector<8x64xf32>
    %209 = arith.mulf %204, %206 : vector<8x64xf32>
    %210 = arith.addf %208, %209 : vector<8x64xf32>
    %211 = math.tanh %210 : vector<8x64xf32>
    %212 = arith.mulf %207, %211 : vector<8x64xf32>
    %213 = vector.extract_strided_slice %212 {offsets = [0, 0], sizes = [8, 32], strides = [1, 1]} : vector<8x64xf32> to vector<8x32xf32>
    %c24_103 = arith.constant 24 : index
    %c0_104 = arith.constant 0 : index
    %214 = vector.load %arg6[%c24_103, %c0_104] : memref<64x64xf32, #tpu.memory_space<vmem>>, vector<8x32xf32>
    tpu.vector_store %arg6[%c24_103, %c0_104], %213 {strides = array<i32>} : memref<64x64xf32, #tpu.memory_space<vmem>>, vector<8x32xf32>,
    %215 = vector.extract_strided_slice %212 {offsets = [0, 32], sizes = [8, 32], strides = [1, 1]} : vector<8x64xf32> to vector<8x32xf32>
    %c32_105 = arith.constant 32 : index
    %c32_106 = arith.constant 32 : index
    %216 = vector.load %arg6[%c32_105, %c32_106] : memref<64x64xf32, #tpu.memory_space<vmem>>, vector<8x32xf32>
    tpu.vector_store %arg6[%c32_105, %c32_106], %215 {strides = array<i32>} : memref<64x64xf32, #tpu.memory_space<vmem>>, vector<8x32xf32>,
    %c32_107 = arith.constant 32 : index
    %c0_108 = arith.constant 0 : index
    %217 = vector.load %arg5[%c32_107, %c0_108] : memref<64x256xf32, #tpu.memory_space<vmem>>, vector<8x256xf32>
    %c24_109 = arith.constant 24 : index
    %c0_110 = arith.constant 0 : index
    %218 = vector.load %arg5[%c24_109, %c0_110] : memref<64x256xf32, #tpu.memory_space<vmem>>, vector<8x256xf32>
    %219 = arith.select %23, %217, %218 : vector<8x256xi1>, vector<8x256xf32>
    %220 = arith.truncf %212 : vector<8x64xf32> to vector<8x64xbf16>
    %cst_111 = arith.constant dense<0.000000e+00> : vector<8x256xf32>
    %221 = tpu.matmul %220, %106, %cst_111 {dimension_numbers = #tpu.dot_dimension_numbers<[1], [0], [0], [1], [0, 0, 1, 1], [], []>} : vector<8x64xbf16>, vector<64x256xbf16>, vector<8x256xf32> -> vector<8x256xf32>
    %222 = arith.addf %219, %221 : vector<8x256xf32>
    %cst_112 = arith.constant 5.000000e-01 : f32
    %223 = vector.broadcast %cst_112 : f32 to vector<8x256xf32>
    %224 = arith.mulf %223, %222 : vector<8x256xf32>
    %225 = arith.select %5, %222, %224 : vector<8x256xi1>, vector<8x256xf32>
    %226 = math.tanh %225 : vector<8x256xf32>
    %cst_113 = arith.constant 5.000000e-01 : f32
    %227 = vector.broadcast %cst_113 : f32 to vector<8x256xf32>
    %228 = arith.mulf %227, %226 : vector<8x256xf32>
    %cst_114 = arith.constant 5.000000e-01 : f32
    %229 = vector.broadcast %cst_114 : f32 to vector<8x256xf32>
    %230 = arith.addf %228, %229 : vector<8x256xf32>
    %231 = arith.select %5, %226, %230 : vector<8x256xi1>, vector<8x256xf32>
    %232 = vector.extract_strided_slice %231 {offsets = [0, 0], sizes = [8, 64], strides = [1, 1]} : vector<8x256xf32> to vector<8x64xf32>
    %233 = vector.extract_strided_slice %231 {offsets = [0, 64], sizes = [8, 64], strides = [1, 1]} : vector<8x256xf32> to vector<8x64xf32>
    %234 = vector.extract_strided_slice %231 {offsets = [0, 128], sizes = [8, 64], strides = [1, 1]} : vector<8x256xf32> to vector<8x64xf32>
    %235 = vector.extract_strided_slice %231 {offsets = [0, 192], sizes = [8, 64], strides = [1, 1]} : vector<8x256xf32> to vector<8x64xf32>
    %236 = arith.mulf %233, %210 : vector<8x64xf32>
    %237 = arith.mulf %232, %234 : vector<8x64xf32>
    %238 = arith.addf %236, %237 : vector<8x64xf32>
    %239 = math.tanh %238 : vector<8x64xf32>
    %240 = arith.mulf %235, %239 : vector<8x64xf32>
    %241 = vector.extract_strided_slice %240 {offsets = [0, 0], sizes = [8, 32], strides = [1, 1]} : vector<8x64xf32> to vector<8x32xf32>
    %c32_115 = arith.constant 32 : index
    %c0_116 = arith.constant 0 : index
    %242 = vector.load %arg6[%c32_115, %c0_116] : memref<64x64xf32, #tpu.memory_space<vmem>>, vector<8x32xf32>
    tpu.vector_store %arg6[%c32_115, %c0_116], %241 {strides = array<i32>} : memref<64x64xf32, #tpu.memory_space<vmem>>, vector<8x32xf32>,
    %243 = vector.extract_strided_slice %240 {offsets = [0, 32], sizes = [8, 32], strides = [1, 1]} : vector<8x64xf32> to vector<8x32xf32>
    %c24_117 = arith.constant 24 : index
    %c32_118 = arith.constant 32 : index
    %244 = vector.load %arg6[%c24_117, %c32_118] : memref<64x64xf32, #tpu.memory_space<vmem>>, vector<8x32xf32>
    tpu.vector_store %arg6[%c24_117, %c32_118], %243 {strides = array<i32>} : memref<64x64xf32, #tpu.memory_space<vmem>>, vector<8x32xf32>,
    %c40_119 = arith.constant 40 : index
    %c0_120 = arith.constant 0 : index
    %245 = vector.load %arg5[%c40_119, %c0_120] : memref<64x256xf32, #tpu.memory_space<vmem>>, vector<8x256xf32>
    %c16_121 = arith.constant 16 : index
    %c0_122 = arith.constant 0 : index
    %246 = vector.load %arg5[%c16_121, %c0_122] : memref<64x256xf32, #tpu.memory_space<vmem>>, vector<8x256xf32>
    %247 = arith.select %23, %245, %246 : vector<8x256xi1>, vector<8x256xf32>
    %248 = arith.truncf %240 : vector<8x64xf32> to vector<8x64xbf16>
    %cst_123 = arith.constant dense<0.000000e+00> : vector<8x256xf32>
    %249 = tpu.matmul %248, %106, %cst_123 {dimension_numbers = #tpu.dot_dimension_numbers<[1], [0], [0], [1], [0, 0, 1, 1], [], []>} : vector<8x64xbf16>, vector<64x256xbf16>, vector<8x256xf32> -> vector<8x256xf32>
    %250 = arith.addf %247, %249 : vector<8x256xf32>
    %cst_124 = arith.constant 5.000000e-01 : f32
    %251 = vector.broadcast %cst_124 : f32 to vector<8x256xf32>
    %252 = arith.mulf %251, %250 : vector<8x256xf32>
    %253 = arith.select %5, %250, %252 : vector<8x256xi1>, vector<8x256xf32>
    %254 = math.tanh %253 : vector<8x256xf32>
    %cst_125 = arith.constant 5.000000e-01 : f32
    %255 = vector.broadcast %cst_125 : f32 to vector<8x256xf32>
    %256 = arith.mulf %255, %254 : vector<8x256xf32>
    %cst_126 = arith.constant 5.000000e-01 : f32
    %257 = vector.broadcast %cst_126 : f32 to vector<8x256xf32>
    %258 = arith.addf %256, %257 : vector<8x256xf32>
    %259 = arith.select %5, %254, %258 : vector<8x256xi1>, vector<8x256xf32>
    %260 = vector.extract_strided_slice %259 {offsets = [0, 0], sizes = [8, 64], strides = [1, 1]} : vector<8x256xf32> to vector<8x64xf32>
    %261 = vector.extract_strided_slice %259 {offsets = [0, 64], sizes = [8, 64], strides = [1, 1]} : vector<8x256xf32> to vector<8x64xf32>
    %262 = vector.extract_strided_slice %259 {offsets = [0, 128], sizes = [8, 64], strides = [1, 1]} : vector<8x256xf32> to vector<8x64xf32>
    %263 = vector.extract_strided_slice %259 {offsets = [0, 192], sizes = [8, 64], strides = [1, 1]} : vector<8x256xf32> to vector<8x64xf32>
    %264 = arith.mulf %261, %238 : vector<8x64xf32>
    %265 = arith.mulf %260, %262 : vector<8x64xf32>
    %266 = arith.addf %264, %265 : vector<8x64xf32>
    %267 = math.tanh %266 : vector<8x64xf32>
    %268 = arith.mulf %263, %267 : vector<8x64xf32>
    %269 = vector.extract_strided_slice %268 {offsets = [0, 0], sizes = [8, 32], strides = [1, 1]} : vector<8x64xf32> to vector<8x32xf32>
    %c40_127 = arith.constant 40 : index
    %c0_128 = arith.constant 0 : index
    %270 = vector.load %arg6[%c40_127, %c0_128] : memref<64x64xf32, #tpu.memory_space<vmem>>, vector<8x32xf32>
    tpu.vector_store %arg6[%c40_127, %c0_128], %269 {strides = array<i32>} : memref<64x64xf32, #tpu.memory_space<vmem>>, vector<8x32xf32>,
    %271 = vector.extract_strided_slice %268 {offsets = [0, 32], sizes = [8, 32], strides = [1, 1]} : vector<8x64xf32> to vector<8x32xf32>
    %c16_129 = arith.constant 16 : index
    %c32_130 = arith.constant 32 : index
    %272 = vector.load %arg6[%c16_129, %c32_130] : memref<64x64xf32, #tpu.memory_space<vmem>>, vector<8x32xf32>
    tpu.vector_store %arg6[%c16_129, %c32_130], %271 {strides = array<i32>} : memref<64x64xf32, #tpu.memory_space<vmem>>, vector<8x32xf32>,
    %c48_131 = arith.constant 48 : index
    %c0_132 = arith.constant 0 : index
    %273 = vector.load %arg5[%c48_131, %c0_132] : memref<64x256xf32, #tpu.memory_space<vmem>>, vector<8x256xf32>
    %c8_133 = arith.constant 8 : index
    %c0_134 = arith.constant 0 : index
    %274 = vector.load %arg5[%c8_133, %c0_134] : memref<64x256xf32, #tpu.memory_space<vmem>>, vector<8x256xf32>
    %275 = arith.select %23, %273, %274 : vector<8x256xi1>, vector<8x256xf32>
    %276 = arith.truncf %268 : vector<8x64xf32> to vector<8x64xbf16>
    %cst_135 = arith.constant dense<0.000000e+00> : vector<8x256xf32>
    %277 = tpu.matmul %276, %106, %cst_135 {dimension_numbers = #tpu.dot_dimension_numbers<[1], [0], [0], [1], [0, 0, 1, 1], [], []>} : vector<8x64xbf16>, vector<64x256xbf16>, vector<8x256xf32> -> vector<8x256xf32>
    %278 = arith.addf %275, %277 : vector<8x256xf32>
    %cst_136 = arith.constant 5.000000e-01 : f32
    %279 = vector.broadcast %cst_136 : f32 to vector<8x256xf32>
    %280 = arith.mulf %279, %278 : vector<8x256xf32>
    %281 = arith.select %5, %278, %280 : vector<8x256xi1>, vector<8x256xf32>
    %282 = math.tanh %281 : vector<8x256xf32>
    %cst_137 = arith.constant 5.000000e-01 : f32
    %283 = vector.broadcast %cst_137 : f32 to vector<8x256xf32>
    %284 = arith.mulf %283, %282 : vector<8x256xf32>
    %cst_138 = arith.constant 5.000000e-01 : f32
    %285 = vector.broadcast %cst_138 : f32 to vector<8x256xf32>
    %286 = arith.addf %284, %285 : vector<8x256xf32>
    %287 = arith.select %5, %282, %286 : vector<8x256xi1>, vector<8x256xf32>
    %288 = vector.extract_strided_slice %287 {offsets = [0, 0], sizes = [8, 64], strides = [1, 1]} : vector<8x256xf32> to vector<8x64xf32>
    %289 = vector.extract_strided_slice %287 {offsets = [0, 64], sizes = [8, 64], strides = [1, 1]} : vector<8x256xf32> to vector<8x64xf32>
    %290 = vector.extract_strided_slice %287 {offsets = [0, 128], sizes = [8, 64], strides = [1, 1]} : vector<8x256xf32> to vector<8x64xf32>
    %291 = vector.extract_strided_slice %287 {offsets = [0, 192], sizes = [8, 64], strides = [1, 1]} : vector<8x256xf32> to vector<8x64xf32>
    %292 = arith.mulf %289, %266 : vector<8x64xf32>
    %293 = arith.mulf %288, %290 : vector<8x64xf32>
    %294 = arith.addf %292, %293 : vector<8x64xf32>
    %295 = math.tanh %294 : vector<8x64xf32>
    %296 = arith.mulf %291, %295 : vector<8x64xf32>
    %297 = vector.extract_strided_slice %296 {offsets = [0, 0], sizes = [8, 32], strides = [1, 1]} : vector<8x64xf32> to vector<8x32xf32>
    %c48_139 = arith.constant 48 : index
    %c0_140 = arith.constant 0 : index
    %298 = vector.load %arg6[%c48_139, %c0_140] : memref<64x64xf32, #tpu.memory_space<vmem>>, vector<8x32xf32>
    tpu.vector_store %arg6[%c48_139, %c0_140], %297 {strides = array<i32>} : memref<64x64xf32, #tpu.memory_space<vmem>>, vector<8x32xf32>,
    %299 = vector.extract_strided_slice %296 {offsets = [0, 32], sizes = [8, 32], strides = [1, 1]} : vector<8x64xf32> to vector<8x32xf32>
    %c8_141 = arith.constant 8 : index
    %c32_142 = arith.constant 32 : index
    %300 = vector.load %arg6[%c8_141, %c32_142] : memref<64x64xf32, #tpu.memory_space<vmem>>, vector<8x32xf32>
    tpu.vector_store %arg6[%c8_141, %c32_142], %299 {strides = array<i32>} : memref<64x64xf32, #tpu.memory_space<vmem>>, vector<8x32xf32>,
    %c56_143 = arith.constant 56 : index
    %c0_144 = arith.constant 0 : index
    %301 = vector.load %arg5[%c56_143, %c0_144] : memref<64x256xf32, #tpu.memory_space<vmem>>, vector<8x256xf32>
    %c0_145 = arith.constant 0 : index
    %c0_146 = arith.constant 0 : index
    %302 = vector.load %arg5[%c0_145, %c0_146] : memref<64x256xf32, #tpu.memory_space<vmem>>, vector<8x256xf32>
    %303 = arith.select %23, %301, %302 : vector<8x256xi1>, vector<8x256xf32>
    %304 = arith.truncf %296 : vector<8x64xf32> to vector<8x64xbf16>
    %cst_147 = arith.constant dense<0.000000e+00> : vector<8x256xf32>
    %305 = tpu.matmul %304, %106, %cst_147 {dimension_numbers = #tpu.dot_dimension_numbers<[1], [0], [0], [1], [0, 0, 1, 1], [], []>} : vector<8x64xbf16>, vector<64x256xbf16>, vector<8x256xf32> -> vector<8x256xf32>
    %306 = arith.addf %303, %305 : vector<8x256xf32>
    %cst_148 = arith.constant 5.000000e-01 : f32
    %307 = vector.broadcast %cst_148 : f32 to vector<8x256xf32>
    %308 = arith.mulf %307, %306 : vector<8x256xf32>
    %309 = arith.select %5, %306, %308 : vector<8x256xi1>, vector<8x256xf32>
    %310 = math.tanh %309 : vector<8x256xf32>
    %cst_149 = arith.constant 5.000000e-01 : f32
    %311 = vector.broadcast %cst_149 : f32 to vector<8x256xf32>
    %312 = arith.mulf %311, %310 : vector<8x256xf32>
    %cst_150 = arith.constant 5.000000e-01 : f32
    %313 = vector.broadcast %cst_150 : f32 to vector<8x256xf32>
    %314 = arith.addf %312, %313 : vector<8x256xf32>
    %315 = arith.select %5, %310, %314 : vector<8x256xi1>, vector<8x256xf32>
    %316 = vector.extract_strided_slice %315 {offsets = [0, 0], sizes = [8, 64], strides = [1, 1]} : vector<8x256xf32> to vector<8x64xf32>
    %317 = vector.extract_strided_slice %315 {offsets = [0, 64], sizes = [8, 64], strides = [1, 1]} : vector<8x256xf32> to vector<8x64xf32>
    %318 = vector.extract_strided_slice %315 {offsets = [0, 128], sizes = [8, 64], strides = [1, 1]} : vector<8x256xf32> to vector<8x64xf32>
    %319 = vector.extract_strided_slice %315 {offsets = [0, 192], sizes = [8, 64], strides = [1, 1]} : vector<8x256xf32> to vector<8x64xf32>
    %320 = arith.mulf %317, %294 : vector<8x64xf32>
    %321 = arith.mulf %316, %318 : vector<8x64xf32>
    %322 = arith.addf %320, %321 : vector<8x64xf32>
    %323 = math.tanh %322 : vector<8x64xf32>
    %324 = arith.mulf %319, %323 : vector<8x64xf32>
    %325 = vector.extract_strided_slice %324 {offsets = [0, 0], sizes = [8, 32], strides = [1, 1]} : vector<8x64xf32> to vector<8x32xf32>
    %c56_151 = arith.constant 56 : index
    %c0_152 = arith.constant 0 : index
    %326 = vector.load %arg6[%c56_151, %c0_152] : memref<64x64xf32, #tpu.memory_space<vmem>>, vector<8x32xf32>
    tpu.vector_store %arg6[%c56_151, %c0_152], %325 {strides = array<i32>} : memref<64x64xf32, #tpu.memory_space<vmem>>, vector<8x32xf32>,
    %327 = vector.extract_strided_slice %324 {offsets = [0, 32], sizes = [8, 32], strides = [1, 1]} : vector<8x64xf32> to vector<8x32xf32>
    %c0_153 = arith.constant 0 : index
    %c32_154 = arith.constant 32 : index
    %328 = vector.load %arg6[%c0_153, %c32_154] : memref<64x64xf32, #tpu.memory_space<vmem>>, vector<8x32xf32>
    tpu.vector_store %arg6[%c0_153, %c32_154], %327 {strides = array<i32>} : memref<64x64xf32, #tpu.memory_space<vmem>>, vector<8x32xf32>,
    %c64 = arith.constant 64 : index
    %c0_155 = arith.constant 0 : index
    %329 = vector.load %arg2[%c64, %c0_155] : memref<193x256xbf16, #tpu.memory_space<vmem>>, vector<64x256xbf16>
    %c192 = arith.constant 192 : index
    %c0_156 = arith.constant 0 : index
    %330 = vector.load %arg2[%c192, %c0_156] : memref<193x256xbf16, #tpu.memory_space<vmem>>, vector<1x256xbf16>
    %331 = arith.extf %330 : vector<1x256xbf16> to vector<1x256xf32>
    %c0_157 = arith.constant 0 : index
    %c0_158 = arith.constant 0 : index
    %332 = vector.load %arg6[%c0_157, %c0_158] : memref<64x64xf32, #tpu.memory_space<vmem>>, vector<64x64xf32>
    %333 = arith.truncf %332 : vector<64x64xf32> to vector<64x64xbf16>
    %cst_159 = arith.constant dense<0.000000e+00> : vector<64x256xf32>
    %334 = tpu.matmul %333, %329, %cst_159 {dimension_numbers = #tpu.dot_dimension_numbers<[1], [0], [0], [1], [0, 0, 1, 1], [], []>} : vector<64x64xbf16>, vector<64x256xbf16>, vector<64x256xf32> -> vector<64x256xf32>
    %335 = vector.broadcast %331 : vector<1x256xf32> to vector<64x256xf32>
    %336 = arith.addf %334, %335 : vector<64x256xf32>
    %c0_160 = arith.constant 0 : index
    %c0_161 = arith.constant 0 : index
    %337 = vector.load %arg5[%c0_160, %c0_161] : memref<64x256xf32, #tpu.memory_space<vmem>>, vector<64x256xf32>
    tpu.vector_store %arg5[%c0_160, %c0_161], %336 {strides = array<i32>} : memref<64x256xf32, #tpu.memory_space<vmem>>, vector<64x256xf32>,
    %c128 = arith.constant 128 : index
    %c0_162 = arith.constant 0 : index
    %338 = vector.load %arg2[%c128, %c0_162] : memref<193x256xbf16, #tpu.memory_space<vmem>>, vector<64x256xbf16>
    %cst_163 = arith.constant 0.000000e+00 : f32
    %339 = vector.broadcast %cst_163 : f32 to vector<8x64xf32>
    %c0_164 = arith.constant 0 : index
    %c0_165 = arith.constant 0 : index
    %340 = vector.load %arg5[%c0_164, %c0_165] : memref<64x256xf32, #tpu.memory_space<vmem>>, vector<8x256xf32>
    %c56_166 = arith.constant 56 : index
    %c0_167 = arith.constant 0 : index
    %341 = vector.load %arg5[%c56_166, %c0_167] : memref<64x256xf32, #tpu.memory_space<vmem>>, vector<8x256xf32>
    %342 = arith.select %23, %340, %341 : vector<8x256xi1>, vector<8x256xf32>
    %cst_168 = arith.constant 5.000000e-01 : f32
    %343 = vector.broadcast %cst_168 : f32 to vector<8x256xf32>
    %344 = arith.mulf %343, %342 : vector<8x256xf32>
    %345 = arith.select %5, %342, %344 : vector<8x256xi1>, vector<8x256xf32>
    %346 = math.tanh %345 : vector<8x256xf32>
    %cst_169 = arith.constant 5.000000e-01 : f32
    %347 = vector.broadcast %cst_169 : f32 to vector<8x256xf32>
    %348 = arith.mulf %347, %346 : vector<8x256xf32>
    %cst_170 = arith.constant 5.000000e-01 : f32
    %349 = vector.broadcast %cst_170 : f32 to vector<8x256xf32>
    %350 = arith.addf %348, %349 : vector<8x256xf32>
    %351 = arith.select %5, %346, %350 : vector<8x256xi1>, vector<8x256xf32>
    %352 = vector.extract_strided_slice %351 {offsets = [0, 0], sizes = [8, 64], strides = [1, 1]} : vector<8x256xf32> to vector<8x64xf32>
    %353 = vector.extract_strided_slice %351 {offsets = [0, 64], sizes = [8, 64], strides = [1, 1]} : vector<8x256xf32> to vector<8x64xf32>
    %354 = vector.extract_strided_slice %351 {offsets = [0, 128], sizes = [8, 64], strides = [1, 1]} : vector<8x256xf32> to vector<8x64xf32>
    %355 = vector.extract_strided_slice %351 {offsets = [0, 192], sizes = [8, 64], strides = [1, 1]} : vector<8x256xf32> to vector<8x64xf32>
    %356 = arith.mulf %353, %339 : vector<8x64xf32>
    %357 = arith.mulf %352, %354 : vector<8x64xf32>
    %358 = arith.addf %356, %357 : vector<8x64xf32>
    %359 = math.tanh %358 : vector<8x64xf32>
    %360 = arith.mulf %355, %359 : vector<8x64xf32>
    %361 = vector.extract_strided_slice %360 {offsets = [0, 32], sizes = [8, 32], strides = [1, 1]} : vector<8x64xf32> to vector<8x32xf32>
    %c8_171 = arith.constant 8 : index
    %c0_172 = arith.constant 0 : index
    %362 = vector.load %arg5[%c8_171, %c0_172] : memref<64x256xf32, #tpu.memory_space<vmem>>, vector<8x256xf32>
    %c48_173 = arith.constant 48 : index
    %c0_174 = arith.constant 0 : index
    %363 = vector.load %arg5[%c48_173, %c0_174] : memref<64x256xf32, #tpu.memory_space<vmem>>, vector<8x256xf32>
    %364 = arith.select %23, %362, %363 : vector<8x256xi1>, vector<8x256xf32>
    %365 = arith.truncf %360 : vector<8x64xf32> to vector<8x64xbf16>
    %cst_175 = arith.constant dense<0.000000e+00> : vector<8x256xf32>
    %366 = tpu.matmul %365, %338, %cst_175 {dimension_numbers = #tpu.dot_dimension_numbers<[1], [0], [0], [1], [0, 0, 1, 1], [], []>} : vector<8x64xbf16>, vector<64x256xbf16>, vector<8x256xf32> -> vector<8x256xf32>
    %367 = arith.addf %364, %366 : vector<8x256xf32>
    %cst_176 = arith.constant 5.000000e-01 : f32
    %368 = vector.broadcast %cst_176 : f32 to vector<8x256xf32>
    %369 = arith.mulf %368, %367 : vector<8x256xf32>
    %370 = arith.select %5, %367, %369 : vector<8x256xi1>, vector<8x256xf32>
    %371 = math.tanh %370 : vector<8x256xf32>
    %cst_177 = arith.constant 5.000000e-01 : f32
    %372 = vector.broadcast %cst_177 : f32 to vector<8x256xf32>
    %373 = arith.mulf %372, %371 : vector<8x256xf32>
    %cst_178 = arith.constant 5.000000e-01 : f32
    %374 = vector.broadcast %cst_178 : f32 to vector<8x256xf32>
    %375 = arith.addf %373, %374 : vector<8x256xf32>
    %376 = arith.select %5, %371, %375 : vector<8x256xi1>, vector<8x256xf32>
    %377 = vector.extract_strided_slice %376 {offsets = [0, 0], sizes = [8, 64], strides = [1, 1]} : vector<8x256xf32> to vector<8x64xf32>
    %378 = vector.extract_strided_slice %376 {offsets = [0, 64], sizes = [8, 64], strides = [1, 1]} : vector<8x256xf32> to vector<8x64xf32>
    %379 = vector.extract_strided_slice %376 {offsets = [0, 128], sizes = [8, 64], strides = [1, 1]} : vector<8x256xf32> to vector<8x64xf32>
    %380 = vector.extract_strided_slice %376 {offsets = [0, 192], sizes = [8, 64], strides = [1, 1]} : vector<8x256xf32> to vector<8x64xf32>
    %381 = arith.mulf %378, %358 : vector<8x64xf32>
    %382 = arith.mulf %377, %379 : vector<8x64xf32>
    %383 = arith.addf %381, %382 : vector<8x64xf32>
    %384 = math.tanh %383 : vector<8x64xf32>
    %385 = arith.mulf %380, %384 : vector<8x64xf32>
    %c16_179 = arith.constant 16 : index
    %c0_180 = arith.constant 0 : index
    %386 = vector.load %arg5[%c16_179, %c0_180] : memref<64x256xf32, #tpu.memory_space<vmem>>, vector<8x256xf32>
    %c40_181 = arith.constant 40 : index
    %c0_182 = arith.constant 0 : index
    %387 = vector.load %arg5[%c40_181, %c0_182] : memref<64x256xf32, #tpu.memory_space<vmem>>, vector<8x256xf32>
    %388 = arith.select %23, %386, %387 : vector<8x256xi1>, vector<8x256xf32>
    %389 = arith.truncf %385 : vector<8x64xf32> to vector<8x64xbf16>
    %cst_183 = arith.constant dense<0.000000e+00> : vector<8x256xf32>
    %390 = tpu.matmul %389, %338, %cst_183 {dimension_numbers = #tpu.dot_dimension_numbers<[1], [0], [0], [1], [0, 0, 1, 1], [], []>} : vector<8x64xbf16>, vector<64x256xbf16>, vector<8x256xf32> -> vector<8x256xf32>
    %391 = arith.addf %388, %390 : vector<8x256xf32>
    %cst_184 = arith.constant 5.000000e-01 : f32
    %392 = vector.broadcast %cst_184 : f32 to vector<8x256xf32>
    %393 = arith.mulf %392, %391 : vector<8x256xf32>
    %394 = arith.select %5, %391, %393 : vector<8x256xi1>, vector<8x256xf32>
    %395 = math.tanh %394 : vector<8x256xf32>
    %cst_185 = arith.constant 5.000000e-01 : f32
    %396 = vector.broadcast %cst_185 : f32 to vector<8x256xf32>
    %397 = arith.mulf %396, %395 : vector<8x256xf32>
    %cst_186 = arith.constant 5.000000e-01 : f32
    %398 = vector.broadcast %cst_186 : f32 to vector<8x256xf32>
    %399 = arith.addf %397, %398 : vector<8x256xf32>
    %400 = arith.select %5, %395, %399 : vector<8x256xi1>, vector<8x256xf32>
    %401 = vector.extract_strided_slice %400 {offsets = [0, 0], sizes = [8, 64], strides = [1, 1]} : vector<8x256xf32> to vector<8x64xf32>
    %402 = vector.extract_strided_slice %400 {offsets = [0, 64], sizes = [8, 64], strides = [1, 1]} : vector<8x256xf32> to vector<8x64xf32>
    %403 = vector.extract_strided_slice %400 {offsets = [0, 128], sizes = [8, 64], strides = [1, 1]} : vector<8x256xf32> to vector<8x64xf32>
    %404 = vector.extract_strided_slice %400 {offsets = [0, 192], sizes = [8, 64], strides = [1, 1]} : vector<8x256xf32> to vector<8x64xf32>
    %405 = arith.mulf %402, %383 : vector<8x64xf32>
    %406 = arith.mulf %401, %403 : vector<8x64xf32>
    %407 = arith.addf %405, %406 : vector<8x64xf32>
    %408 = math.tanh %407 : vector<8x64xf32>
    %409 = arith.mulf %404, %408 : vector<8x64xf32>
    %c24_187 = arith.constant 24 : index
    %c0_188 = arith.constant 0 : index
    %410 = vector.load %arg5[%c24_187, %c0_188] : memref<64x256xf32, #tpu.memory_space<vmem>>, vector<8x256xf32>
    %c32_189 = arith.constant 32 : index
    %c0_190 = arith.constant 0 : index
    %411 = vector.load %arg5[%c32_189, %c0_190] : memref<64x256xf32, #tpu.memory_space<vmem>>, vector<8x256xf32>
    %412 = arith.select %23, %410, %411 : vector<8x256xi1>, vector<8x256xf32>
    %413 = arith.truncf %409 : vector<8x64xf32> to vector<8x64xbf16>
    %cst_191 = arith.constant dense<0.000000e+00> : vector<8x256xf32>
    %414 = tpu.matmul %413, %338, %cst_191 {dimension_numbers = #tpu.dot_dimension_numbers<[1], [0], [0], [1], [0, 0, 1, 1], [], []>} : vector<8x64xbf16>, vector<64x256xbf16>, vector<8x256xf32> -> vector<8x256xf32>
    %415 = arith.addf %412, %414 : vector<8x256xf32>
    %cst_192 = arith.constant 5.000000e-01 : f32
    %416 = vector.broadcast %cst_192 : f32 to vector<8x256xf32>
    %417 = arith.mulf %416, %415 : vector<8x256xf32>
    %418 = arith.select %5, %415, %417 : vector<8x256xi1>, vector<8x256xf32>
    %419 = math.tanh %418 : vector<8x256xf32>
    %cst_193 = arith.constant 5.000000e-01 : f32
    %420 = vector.broadcast %cst_193 : f32 to vector<8x256xf32>
    %421 = arith.mulf %420, %419 : vector<8x256xf32>
    %cst_194 = arith.constant 5.000000e-01 : f32
    %422 = vector.broadcast %cst_194 : f32 to vector<8x256xf32>
    %423 = arith.addf %421, %422 : vector<8x256xf32>
    %424 = arith.select %5, %419, %423 : vector<8x256xi1>, vector<8x256xf32>
    %425 = vector.extract_strided_slice %424 {offsets = [0, 0], sizes = [8, 64], strides = [1, 1]} : vector<8x256xf32> to vector<8x64xf32>
    %426 = vector.extract_strided_slice %424 {offsets = [0, 64], sizes = [8, 64], strides = [1, 1]} : vector<8x256xf32> to vector<8x64xf32>
    %427 = vector.extract_strided_slice %424 {offsets = [0, 128], sizes = [8, 64], strides = [1, 1]} : vector<8x256xf32> to vector<8x64xf32>
    %428 = vector.extract_strided_slice %424 {offsets = [0, 192], sizes = [8, 64], strides = [1, 1]} : vector<8x256xf32> to vector<8x64xf32>
    %429 = arith.mulf %426, %407 : vector<8x64xf32>
    %430 = arith.mulf %425, %427 : vector<8x64xf32>
    %431 = arith.addf %429, %430 : vector<8x64xf32>
    %432 = math.tanh %431 : vector<8x64xf32>
    %433 = arith.mulf %428, %432 : vector<8x64xf32>
    %c32_195 = arith.constant 32 : index
    %c0_196 = arith.constant 0 : index
    %434 = vector.load %arg5[%c32_195, %c0_196] : memref<64x256xf32, #tpu.memory_space<vmem>>, vector<8x256xf32>
    %c24_197 = arith.constant 24 : index
    %c0_198 = arith.constant 0 : index
    %435 = vector.load %arg5[%c24_197, %c0_198] : memref<64x256xf32, #tpu.memory_space<vmem>>, vector<8x256xf32>
    %436 = arith.select %23, %434, %435 : vector<8x256xi1>, vector<8x256xf32>
    %437 = arith.truncf %433 : vector<8x64xf32> to vector<8x64xbf16>
    %cst_199 = arith.constant dense<0.000000e+00> : vector<8x256xf32>
    %438 = tpu.matmul %437, %338, %cst_199 {dimension_numbers = #tpu.dot_dimension_numbers<[1], [0], [0], [1], [0, 0, 1, 1], [], []>} : vector<8x64xbf16>, vector<64x256xbf16>, vector<8x256xf32> -> vector<8x256xf32>
    %439 = arith.addf %436, %438 : vector<8x256xf32>
    %cst_200 = arith.constant 5.000000e-01 : f32
    %440 = vector.broadcast %cst_200 : f32 to vector<8x256xf32>
    %441 = arith.mulf %440, %439 : vector<8x256xf32>
    %442 = arith.select %5, %439, %441 : vector<8x256xi1>, vector<8x256xf32>
    %443 = math.tanh %442 : vector<8x256xf32>
    %cst_201 = arith.constant 5.000000e-01 : f32
    %444 = vector.broadcast %cst_201 : f32 to vector<8x256xf32>
    %445 = arith.mulf %444, %443 : vector<8x256xf32>
    %cst_202 = arith.constant 5.000000e-01 : f32
    %446 = vector.broadcast %cst_202 : f32 to vector<8x256xf32>
    %447 = arith.addf %445, %446 : vector<8x256xf32>
    %448 = arith.select %5, %443, %447 : vector<8x256xi1>, vector<8x256xf32>
    %449 = vector.extract_strided_slice %448 {offsets = [0, 0], sizes = [8, 64], strides = [1, 1]} : vector<8x256xf32> to vector<8x64xf32>
    %450 = vector.extract_strided_slice %448 {offsets = [0, 64], sizes = [8, 64], strides = [1, 1]} : vector<8x256xf32> to vector<8x64xf32>
    %451 = vector.extract_strided_slice %448 {offsets = [0, 128], sizes = [8, 64], strides = [1, 1]} : vector<8x256xf32> to vector<8x64xf32>
    %452 = vector.extract_strided_slice %448 {offsets = [0, 192], sizes = [8, 64], strides = [1, 1]} : vector<8x256xf32> to vector<8x64xf32>
    %453 = arith.mulf %450, %431 : vector<8x64xf32>
    %454 = arith.mulf %449, %451 : vector<8x64xf32>
    %455 = arith.addf %453, %454 : vector<8x64xf32>
    %456 = math.tanh %455 : vector<8x64xf32>
    %457 = arith.mulf %452, %456 : vector<8x64xf32>
    %c40_203 = arith.constant 40 : index
    %c0_204 = arith.constant 0 : index
    %458 = vector.load %arg5[%c40_203, %c0_204] : memref<64x256xf32, #tpu.memory_space<vmem>>, vector<8x256xf32>
    %c16_205 = arith.constant 16 : index
    %c0_206 = arith.constant 0 : index
    %459 = vector.load %arg5[%c16_205, %c0_206] : memref<64x256xf32, #tpu.memory_space<vmem>>, vector<8x256xf32>
    %460 = arith.select %23, %458, %459 : vector<8x256xi1>, vector<8x256xf32>
    %461 = arith.truncf %457 : vector<8x64xf32> to vector<8x64xbf16>
    %cst_207 = arith.constant dense<0.000000e+00> : vector<8x256xf32>
    %462 = tpu.matmul %461, %338, %cst_207 {dimension_numbers = #tpu.dot_dimension_numbers<[1], [0], [0], [1], [0, 0, 1, 1], [], []>} : vector<8x64xbf16>, vector<64x256xbf16>, vector<8x256xf32> -> vector<8x256xf32>
    %463 = arith.addf %460, %462 : vector<8x256xf32>
    %cst_208 = arith.constant 5.000000e-01 : f32
    %464 = vector.broadcast %cst_208 : f32 to vector<8x256xf32>
    %465 = arith.mulf %464, %463 : vector<8x256xf32>
    %466 = arith.select %5, %463, %465 : vector<8x256xi1>, vector<8x256xf32>
    %467 = math.tanh %466 : vector<8x256xf32>
    %cst_209 = arith.constant 5.000000e-01 : f32
    %468 = vector.broadcast %cst_209 : f32 to vector<8x256xf32>
    %469 = arith.mulf %468, %467 : vector<8x256xf32>
    %cst_210 = arith.constant 5.000000e-01 : f32
    %470 = vector.broadcast %cst_210 : f32 to vector<8x256xf32>
    %471 = arith.addf %469, %470 : vector<8x256xf32>
    %472 = arith.select %5, %467, %471 : vector<8x256xi1>, vector<8x256xf32>
    %473 = vector.extract_strided_slice %472 {offsets = [0, 0], sizes = [8, 64], strides = [1, 1]} : vector<8x256xf32> to vector<8x64xf32>
    %474 = vector.extract_strided_slice %472 {offsets = [0, 64], sizes = [8, 64], strides = [1, 1]} : vector<8x256xf32> to vector<8x64xf32>
    %475 = vector.extract_strided_slice %472 {offsets = [0, 128], sizes = [8, 64], strides = [1, 1]} : vector<8x256xf32> to vector<8x64xf32>
    %476 = vector.extract_strided_slice %472 {offsets = [0, 192], sizes = [8, 64], strides = [1, 1]} : vector<8x256xf32> to vector<8x64xf32>
    %477 = arith.mulf %474, %455 : vector<8x64xf32>
    %478 = arith.mulf %473, %475 : vector<8x64xf32>
    %479 = arith.addf %477, %478 : vector<8x64xf32>
    %480 = math.tanh %479 : vector<8x64xf32>
    %481 = arith.mulf %476, %480 : vector<8x64xf32>
    %c48_211 = arith.constant 48 : index
    %c0_212 = arith.constant 0 : index
    %482 = vector.load %arg5[%c48_211, %c0_212] : memref<64x256xf32, #tpu.memory_space<vmem>>, vector<8x256xf32>
    %c8_213 = arith.constant 8 : index
    %c0_214 = arith.constant 0 : index
    %483 = vector.load %arg5[%c8_213, %c0_214] : memref<64x256xf32, #tpu.memory_space<vmem>>, vector<8x256xf32>
    %484 = arith.select %23, %482, %483 : vector<8x256xi1>, vector<8x256xf32>
    %485 = arith.truncf %481 : vector<8x64xf32> to vector<8x64xbf16>
    %cst_215 = arith.constant dense<0.000000e+00> : vector<8x256xf32>
    %486 = tpu.matmul %485, %338, %cst_215 {dimension_numbers = #tpu.dot_dimension_numbers<[1], [0], [0], [1], [0, 0, 1, 1], [], []>} : vector<8x64xbf16>, vector<64x256xbf16>, vector<8x256xf32> -> vector<8x256xf32>
    %487 = arith.addf %484, %486 : vector<8x256xf32>
    %cst_216 = arith.constant 5.000000e-01 : f32
    %488 = vector.broadcast %cst_216 : f32 to vector<8x256xf32>
    %489 = arith.mulf %488, %487 : vector<8x256xf32>
    %490 = arith.select %5, %487, %489 : vector<8x256xi1>, vector<8x256xf32>
    %491 = math.tanh %490 : vector<8x256xf32>
    %cst_217 = arith.constant 5.000000e-01 : f32
    %492 = vector.broadcast %cst_217 : f32 to vector<8x256xf32>
    %493 = arith.mulf %492, %491 : vector<8x256xf32>
    %cst_218 = arith.constant 5.000000e-01 : f32
    %494 = vector.broadcast %cst_218 : f32 to vector<8x256xf32>
    %495 = arith.addf %493, %494 : vector<8x256xf32>
    %496 = arith.select %5, %491, %495 : vector<8x256xi1>, vector<8x256xf32>
    %497 = vector.extract_strided_slice %496 {offsets = [0, 0], sizes = [8, 64], strides = [1, 1]} : vector<8x256xf32> to vector<8x64xf32>
    %498 = vector.extract_strided_slice %496 {offsets = [0, 64], sizes = [8, 64], strides = [1, 1]} : vector<8x256xf32> to vector<8x64xf32>
    %499 = vector.extract_strided_slice %496 {offsets = [0, 128], sizes = [8, 64], strides = [1, 1]} : vector<8x256xf32> to vector<8x64xf32>
    %500 = vector.extract_strided_slice %496 {offsets = [0, 192], sizes = [8, 64], strides = [1, 1]} : vector<8x256xf32> to vector<8x64xf32>
    %501 = arith.mulf %498, %479 : vector<8x64xf32>
    %502 = arith.mulf %497, %499 : vector<8x64xf32>
    %503 = arith.addf %501, %502 : vector<8x64xf32>
    %504 = math.tanh %503 : vector<8x64xf32>
    %505 = arith.mulf %500, %504 : vector<8x64xf32>
    %c56_219 = arith.constant 56 : index
    %c0_220 = arith.constant 0 : index
    %506 = vector.load %arg5[%c56_219, %c0_220] : memref<64x256xf32, #tpu.memory_space<vmem>>, vector<8x256xf32>
    %c0_221 = arith.constant 0 : index
    %c0_222 = arith.constant 0 : index
    %507 = vector.load %arg5[%c0_221, %c0_222] : memref<64x256xf32, #tpu.memory_space<vmem>>, vector<8x256xf32>
    %508 = arith.select %23, %506, %507 : vector<8x256xi1>, vector<8x256xf32>
    %509 = arith.truncf %505 : vector<8x64xf32> to vector<8x64xbf16>
    %cst_223 = arith.constant dense<0.000000e+00> : vector<8x256xf32>
    %510 = tpu.matmul %509, %338, %cst_223 {dimension_numbers = #tpu.dot_dimension_numbers<[1], [0], [0], [1], [0, 0, 1, 1], [], []>} : vector<8x64xbf16>, vector<64x256xbf16>, vector<8x256xf32> -> vector<8x256xf32>
    %511 = arith.addf %508, %510 : vector<8x256xf32>
    %cst_224 = arith.constant 5.000000e-01 : f32
    %512 = vector.broadcast %cst_224 : f32 to vector<8x256xf32>
    %513 = arith.mulf %512, %511 : vector<8x256xf32>
    %514 = arith.select %5, %511, %513 : vector<8x256xi1>, vector<8x256xf32>
    %515 = math.tanh %514 : vector<8x256xf32>
    %cst_225 = arith.constant 5.000000e-01 : f32
    %516 = vector.broadcast %cst_225 : f32 to vector<8x256xf32>
    %517 = arith.mulf %516, %515 : vector<8x256xf32>
    %cst_226 = arith.constant 5.000000e-01 : f32
    %518 = vector.broadcast %cst_226 : f32 to vector<8x256xf32>
    %519 = arith.addf %517, %518 : vector<8x256xf32>
    %520 = arith.select %5, %515, %519 : vector<8x256xi1>, vector<8x256xf32>
    %521 = vector.extract_strided_slice %520 {offsets = [0, 0], sizes = [8, 64], strides = [1, 1]} : vector<8x256xf32> to vector<8x64xf32>
    %522 = vector.extract_strided_slice %520 {offsets = [0, 64], sizes = [8, 64], strides = [1, 1]} : vector<8x256xf32> to vector<8x64xf32>
    %523 = vector.extract_strided_slice %520 {offsets = [0, 128], sizes = [8, 64], strides = [1, 1]} : vector<8x256xf32> to vector<8x64xf32>
    %524 = vector.extract_strided_slice %520 {offsets = [0, 192], sizes = [8, 64], strides = [1, 1]} : vector<8x256xf32> to vector<8x64xf32>
    %525 = arith.mulf %522, %503 : vector<8x64xf32>
    %526 = arith.mulf %521, %523 : vector<8x64xf32>
    %527 = arith.addf %525, %526 : vector<8x64xf32>
    %528 = math.tanh %527 : vector<8x64xf32>
    %529 = arith.mulf %524, %528 : vector<8x64xf32>
    %530 = vector.extract_strided_slice %529 {offsets = [0, 0], sizes = [8, 32], strides = [1, 1]} : vector<8x64xf32> to vector<8x32xf32>
    %c0_227 = arith.constant 0 : index
    %c0_228 = arith.constant 0 : index
    %531 = vector.load %arg3[%c0_227, %c0_228] : memref<65x128xf32, #tpu.memory_space<vmem>>, vector<65x128xf32>
    %532 = vector.extract_strided_slice %531 {offsets = [0, 0], sizes = [32, 128], strides = [1, 1]} : vector<65x128xf32> to vector<32x128xf32>
    %cst_229 = arith.constant dense<0.000000e+00> : vector<8x128xf32>
    %533 = tpu.matmul %530, %532, %cst_229 {dimension_numbers = #tpu.dot_dimension_numbers<[1], [0], [0], [1], [0, 0, 1, 1], [], []>} : vector<8x32xf32>, vector<32x128xf32>, vector<8x128xf32> -> vector<8x128xf32>
    %534 = vector.extract_strided_slice %531 {offsets = [32, 0], sizes = [32, 128], strides = [1, 1]} : vector<65x128xf32> to vector<32x128xf32>
    %cst_230 = arith.constant dense<0.000000e+00> : vector<8x128xf32>
    %535 = tpu.matmul %361, %534, %cst_230 {dimension_numbers = #tpu.dot_dimension_numbers<[1], [0], [0], [1], [0, 0, 1, 1], [], []>} : vector<8x32xf32>, vector<32x128xf32>, vector<8x128xf32> -> vector<8x128xf32>
    %536 = arith.addf %533, %535 : vector<8x128xf32>
    %537 = vector.extract_strided_slice %531 {offsets = [64, 0], sizes = [1, 128], strides = [1, 1]} : vector<65x128xf32> to vector<1x128xf32>
    %538 = vector.broadcast %537 : vector<1x128xf32> to vector<8x128xf32>
    %539 = arith.addf %536, %538 : vector<8x128xf32>
    %c0_231 = arith.constant 0 : index
    %c0_232 = arith.constant 0 : index
    %540 = vector.load %arg4[%c0_231, %c0_232] : memref<8x128xf32, #tpu.memory_space<vmem>>, vector<8x128xf32>
    tpu.vector_store %arg4[%c0_231, %c0_232], %539 {strides = array<i32>} : memref<8x128xf32, #tpu.memory_space<vmem>>, vector<8x128xf32>,
    return
  }
}

</mosaic_0001>

<bundles_post_ra>
// kernel: _forward.1
= control target key start
LH: loop header
LB: loop body
LE: loop exit
PB: predicated region body
PF: predicated region fallthrough
CT: control target
= control target key end

     0   :  { %9 = vsyncpa [#allocation6], 0  ;;  %s2997_s0 = inlined_call_operand.vmem [shape: s32[16], index: 0, kind: input, shape index: {}]   ;;  %s2998_s1 = inlined_call_operand.hbm [shape: f32[50,1,256], index: 1, kind: input, shape index: {}]   ;;  %s2999_s2 = inlined_call_operand.hbm [shape: bf16[193,256], index: 2, kind: input, shape index: {}]   ;;  %s3000_s3 = inlined_call_operand.hbm [shape: f32[65,128], index: 3, kind: input, shape index: {}]   ;;  %s3001_s4 = inlined_call_operand.vmem [shape: f32[8,128], index: 4, kind: output, shape index: {}]  }
   0x1   :  { %10 = vsyncpa [#allocation5], 0 }
   0x2   :  { %11 = vsyncpa [#allocation9], 0  ;;  %s2226_s15 = smov [#allocation8]   ;;  %s18_s19 = sshll.u32 %s2997_s0, 4  ;;  %s19_s19 = int_to_ptr.vmem [resolvable:$true] %s18_s19 }
   0x3   :  { %s39_s16 = sshll.u32 %s2226_s15, 4  ;;  %s2142_s22 = scalar_lea.hbm %s2999_s2, 3200  ;;  %s40_s16 = int_to_ptr.vmem [resolvable:$true] %s39_s16 }
   0x4   :  { %p2143_p0 = scmp.ne.s32.totalorder %s2999_s2, %s2142_s22  ;;  %p2146_p1 = scmp.lt.u32.totalorder %s2142_s22, %s2999_s2 }
   0x6   :  { %p2148_p2 = pnand %p2146_p1, %p2143_p0 }
   0x8   :  { %2151 = shalt.err (!%p2148_p2)
}
   0x9   :  { %s2152_s27 = scalar_lea.vmem %s40_s16, 3200  ;;  %p2157_p4 = scmp.lt.s32.totalorder %s40_s16, %s40_s16 }
   0xa   :  { %p2153_p3 = scmp.ne.s32.totalorder %s40_s16, %s2152_s27  ;;  %p2158_p5 = scmp.lt.s32.totalorder %s2152_s27, %s2152_s27 }
   0xc   :  { %p2159_p6 = por %p2158_p5, %p2157_p4 }
   0xe   :  { %p2160_p7 = pnand %p2159_p6, %p2153_p3 }
  0x10   :  { %2163 = shalt.err (!%p2160_p7)
}
  0x11   :  { %s2227_s0 = smov 128   ;;  %s2228_s28 = smov 8  }
  0x12   :  { %45 = dma.hbm_to_vmem [thread:$0]  %s2999_s2, 3200, %s40_s16, [#allocation9], %s2227_s0, %s2227_s0, %s2228_s28  }
  0x13   :  { %s2164_s5 = scalar_lea.vmem %s19_s19, 16  ;;  %p2169_p9 = scmp.lt.s32.totalorder %s19_s19, %s19_s19 }
  0x14   :  { %p2165_p8 = scmp.ne.s32.totalorder %s19_s19, %s2164_s5  ;;  %p2170_p10 = scmp.lt.s32.totalorder %s2164_s5, %s2164_s5 }
  0x16   :  { %p2171_p11 = por %p2170_p10, %p2169_p9 }
  0x18   :  { %p2172_p12 = pnand %p2171_p11, %p2165_p8 }
  0x1a   :  { %2175 = shalt.err (!%p2172_p12)
}
  0x1b   :  { %s2229_s6 = smov [#allocation4]   ;;  %s2230_s7 = smov [#allocation7]  }
  0x1c   :  { %21 = dma.vmem_to_smem %s19_s19, 16, %s2229_s6, [#allocation6]  }
  0x1d   :  { %s27_s8 = sshll.u32 %s2230_s7, 4  ;;  %s2176_s11 = scalar_lea.hbm %s2998_s1, 1600  ;;  %s28_s8 = int_to_ptr.vmem [resolvable:$true] %s27_s8 }
  0x1e   :  { %p2177_p13 = scmp.ne.s32.totalorder %s2998_s1, %s2176_s11  ;;  %p2180_p0 = scmp.lt.u32.totalorder %s2176_s11, %s2998_s1 }
  0x20   :  { %p2182_p1 = pnand %p2180_p0, %p2177_p13 }
  0x22   :  { %2185 = shalt.err (!%p2182_p1)
}
  0x23   :  { %s2186_s15 = scalar_lea.vmem %s28_s8, 1600  ;;  %p2191_p3 = scmp.lt.s32.totalorder %s28_s8, %s28_s8 }
  0x24   :  { %p2187_p2 = scmp.ne.s32.totalorder %s28_s8, %s2186_s15  ;;  %p2192_p4 = scmp.lt.s32.totalorder %s2186_s15, %s2186_s15 }
  0x26   :  { %p2193_p5 = por %p2192_p4, %p2191_p3 }
  0x28   :  { %p2194_p6 = pnand %p2193_p5, %p2187_p2 }
  0x2a   :  { %2197 = shalt.err (!%p2194_p6)
}
  0x2b   :  { %s2231_s16 = smov 32   ;;  %s2232_s17 = smov 2  }
  0x2c   :  { %33 = dma.hbm_to_vmem [thread:$0]  %s2998_s1, 1600, %s28_s8, [#allocation5], %s2231_s16, %s2231_s16, %s2232_s17  }
  0x2d   :  { %s2233_s20 = smov [#allocation10]   ;;  %s2198_s24 = scalar_lea.hbm %s3000_s3, 1152 }
  0x2e   :  { %s51_s21 = sshll.u32 %s2233_s20, 4  ;;  %p2199_p7 = scmp.ne.s32.totalorder %s3000_s3, %s2198_s24  ;;  %s52_s21 = int_to_ptr.vmem [resolvable:$true] %s51_s21 }
  0x2f   :  { %p2202_p8 = scmp.lt.u32.totalorder %s2198_s24, %s3000_s3 }
  0x31   :  { %p2204_p9 = pnand %p2202_p8, %p2199_p7 }
  0x33   :  { %2207 = shalt.err (!%p2204_p9)
}
  0x34   :  { %s2208_s30 = scalar_lea.vmem %s52_s21, 1152  ;;  %p2213_p11 = scmp.lt.s32.totalorder %s52_s21, %s52_s21 }
  0x35   :  { %p2209_p10 = scmp.ne.s32.totalorder %s52_s21, %s2208_s30  ;;  %p2214_p12 = scmp.lt.s32.totalorder %s2208_s30, %s2208_s30 }
  0x37   :  { %p2215_p13 = por %p2214_p12, %p2213_p11 }
  0x39   :  { %p2216_p0 = pnand %p2215_p13, %p2209_p10 }
  0x3b   :  { %2219 = shalt.err (!%p2216_p0)
}
  0x3c   :  { %57 = dma.hbm_to_vmem [thread:$0]  %s3000_s3, 1152, %s52_s21, [#allocation9], %s2227_s0, %s2227_s0, %s2228_s28  }
  0x3d   :  { %2220 = dma.done.wait [#allocation6], 16  }
  0x3e   :  { %2221 = vsyncadd [#allocation6], 4294967280 }
  0x3f   :  { %2222 = dma.done.wait [#allocation5], 1600  }
  0x40   :  { %2223 = vsyncadd [#allocation5], 4294965696 }
  0x41   :  { %2224 = dma.done.wait [#allocation9], 4352  }
  0x42   :  { %2225 = vsyncadd [#allocation9], 4294962944 }
  0x43   :  { %70 = sfence }
  0x44   :  { %s123_s6 = sld [smem:[#allocation4]]  ;;  %v2234_v0 = vmov 0.0   ;;  %s1904_s8 = sld [smem:[#allocation4 + $0x7]]  ;;  %v72_v1 = vlaneseq  ;;  %v2377_v30 = vld [vmem:[#allocation8 + $0x4] ss:$8 sps:$4 sm:$0xff]   ;;  %v2236_v34 = vmov 0  }
  0x45   :  { %s1878_s7 = sld [smem:[#allocation4 + $0x8]]  ;;  %107 = vst [vmem:[#allocation2] sm:$0xff] %v2234_v0  ;;  %108 = vst [vmem:[#allocation2 + $0x8] sm:$0xff] %v2234_v0  ;;  %s2315_s3 = sld [smem:[#allocation4 + $0xf]]  ;;  %v2379_v31 = vld [vmem:[#allocation8] ss:$8 sps:$4 sm:$0xff]   ;;  %335 = vmatprep.subr.bf16.mxu0 %v2377_v30  ;;  %418 = vmatprep.subr.bf16.mxu1 %v2377_v30 }
  0x46   :  { %121 = vst [vmem:[#allocation2 + $0x70] sm:$0xff] %v2234_v0  ;;  %122 = vst [vmem:[#allocation2 + $0x78] sm:$0xff] %v2234_v0  ;;  %v73_v2 = vand.u32 127, %v72_v1  ;;  %vm2331_vm0 = vcmp.lt.s32.totalorder %v72_v1, 256  ;;  %s2235_s14 = smov 64   ;;  %336 = vmatpush1.bf16.msra.mxu0 %v2379_v31  ;;  %367 = vmatprep.mubr.bf16.mxu0 %v2236_v34  ;;  %s1880_s15 = sld [smem:[#allocation4 + $0x1]] }
  0x47   :  { %109 = vst [vmem:[#allocation2 + $0x10] sm:$0xff] %v2234_v0  ;;  %110 = vst [vmem:[#allocation2 + $0x18] sm:$0xff] %v2234_v0  ;;  %v2381_v32 = vld [vmem:[#allocation8 + $0x14] ss:$8 sps:$4 sm:$0xff]   ;;  %v2386_v33 = vld [vmem:[#allocation8 + $0x10] ss:$8 sps:$4 sm:$0xff]   ;;  %419 = vmatpush1.bf16.msra.mxu1 %v2379_v31  ;;  %450 = vmatprep.mubr.bf16.mxu1 %v2236_v34 }
  0x48   :  { %111 = vst [vmem:[#allocation2 + $0x20] sm:$0xff] %v2234_v0  ;;  %112 = vst [vmem:[#allocation2 + $0x28] sm:$0xff] %v2234_v0  ;;  %v2335_v6 = vadd.s32 128, %v73_v2  ;;  %v85_v9 = vand.u32 63, %v73_v2  ;;  %337 = vmatprep.subr.bf16.mxu0 %v2381_v32  ;;  %v2390_v35 = vld [vmem:[#allocation8 + $0x24] ss:$8 sps:$4 sm:$0xff]   ;;  %420 = vmatprep.subr.bf16.mxu1 %v2381_v32 }
  0x49   :  { %113 = vst [vmem:[#allocation2 + $0x30] sm:$0xff] %v2234_v0  ;;  %114 = vst [vmem:[#allocation2 + $0x38] sm:$0xff] %v2234_v0  ;;  %v2396_v36 = vld [vmem:[#allocation8 + $0x20] ss:$8 sps:$4 sm:$0xff]   ;;  %v2399_v37 = vld [vmem:[#allocation8 + $0x34] ss:$8 sps:$4 sm:$0xff]  }
  0x4a   :  { %115 = vst [vmem:[#allocation2 + $0x40] sm:$0xff] %v2234_v0  ;;  %116 = vst [vmem:[#allocation2 + $0x48] sm:$0xff] %v2234_v0  ;;  %s1877_s0 = sshll.u32 %s123_s6, 1  ;;  %s1905_s11 = sshll.u32 %s1904_s8, 1  ;;  %v92_v10 = vand.u32 63, %v2335_v6  ;;  %vm2347_vm1 = vcmp.lt.s32.totalorder %v85_v9, 32  ;;  %338 = vmatpush1.bf16.msra.mxu0 %v2386_v33 }
  0x4b   :  { %117 = vst [vmem:[#allocation2 + $0x50] sm:$0xff] %v2234_v0  ;;  %118 = vst [vmem:[#allocation2 + $0x58] sm:$0xff] %v2234_v0  ;;  %s1879_s28 = sshll.u32 %s1878_s7, 1  ;;  %s125_s9 = scalar_lea.vmem [#allocation7], %s1877_s0  ;;  %vm78_vm3 = vcmp.lt.s32.totalorder %v2335_v6, 192  ;;  %339 = vmatprep.subr.bf16.mxu0 %v2390_v35  ;;  %421 = vmatpush1.bf16.msra.mxu1 %v2386_v33  ;;  %vm331_vm4 = vcmask 523264  }
  0x4c   :  { %119 = vst [vmem:[#allocation2 + $0x60] sm:$0xff] %v2234_v0  ;;  %120 = vst [vmem:[#allocation2 + $0x68] sm:$0xff] %v2234_v0  ;;  %v126_v4 = vld [vmem:[%s125_s9] sm:$0x3]  ;;  %s135_s10 = scalar_lea.vmem [#allocation7], %s1879_s28  ;;  %s1907_s12 = sshll.u32 %s2315_s3, 1  ;;  %422 = vmatprep.subr.bf16.mxu1 %v2390_v35 }
  0x4d   :  { %v136_v5 = vld [vmem:[%s135_s10] sm:$0x3]  ;;  %131 = vst.msk [vmem:[#allocation2] ss:$8 sm:$0x3] %vm2331_vm0, %v126_v4  ;;  %s226_s13 = scalar_lea.vmem [#allocation7], %s1905_s11 }
  0x4e   :  { %138 = vst.msk [vmem:[#allocation2 + $0x1] ss:$8 sm:$0x3] %vm2331_vm0, %v136_v5  ;;  %v227_v7 = vld [vmem:[%s226_s13] sm:$0x3]  ;;  %s233_s2 = scalar_lea.vmem [#allocation7], %s1907_s12  ;;  %340 = vmatpush1.bf16.msra.mxu0 %v2396_v36 }
  0x4f   :  { %229 = vst.msk [vmem:[#allocation2 + $0x70] ss:$8 sm:$0x3] %vm2331_vm0, %v227_v7  ;;  %v234_v8 = vld [vmem:[%s233_s2] sm:$0x3]  ;;  %vm2351_vm2 = vcmp.lt.s32.totalorder %v92_v10, 32  ;;  %341 = vmatprep.subr.bf16.mxu0 %v2399_v37  ;;  %423 = vmatpush1.bf16.msra.mxu1 %v2396_v36 }
  0x50   :  { %236 = vst.msk [vmem:[#allocation2 + $0x71] ss:$8 sm:$0x3] %vm2331_vm0, %v234_v8  ;;  %v2404_v38 = vld [vmem:[#allocation8 + $0x30] ss:$8 sps:$4 sm:$0xff]   ;;  %424 = vmatprep.subr.bf16.mxu1 %v2399_v37  ;;  %s1882_s17 = sld [smem:[#allocation4 + $0x9]] }
  0x51   :  { %s1900_s18 = sld [smem:[#allocation4 + $0x6]]  ;;  %s1881_s20 = sshll.u32 %s1880_s15, 1  ;;  %vm277_vm5 = vcmask 261120   ;;  %vm279_vm6 = vcmask 523520   ;;  %vm2238_vm7 = vmmov 0  }
  0x52   :  { %342 = vmatpush1.bf16.msra.mxu0 %v2404_v38  ;;  %s1902_s19 = sld [smem:[#allocation4 + $0xe]]  ;;  %s142_s22 = scalar_lea.vmem [#allocation7], %s1881_s20 }
  0x53   :  { %425 = vmatpush1.bf16.msra.mxu1 %v2404_v38  ;;  %501 = vmatprep.subr.bf16.mxu0 %v2377_v30  ;;  %v143_v43 = vld [vmem:[%s142_s22] sm:$0x3]  ;;  %s1884_s29 = sld [smem:[#allocation4 + $0x2]]  ;;  %s1896_s1 = sld [smem:[#allocation4 + $0x5]] }
  0x54   :  { %584 = vmatprep.subr.bf16.mxu1 %v2377_v30  ;;  %145 = vst.msk [vmem:[#allocation2 + $0x10] ss:$8 sm:$0x3] %vm2331_vm0, %v143_v43  ;;  %s1886_s30 = sld [smem:[#allocation4 + $0xa]]  ;;  %s1898_s5 = sld [smem:[#allocation4 + $0xd]] }
  0x55   :  { %v2355_v13 = vld [vmem:[#allocation2] sm:$0xff]  ;;  %v2357_v14 = vld [vmem:[#allocation2 + $0x8] sm:$0xff]  ;;  %s1888_s11 = sld [smem:[#allocation4 + $0x3]]  ;;  %s1892_s13 = sld [smem:[#allocation4 + $0x4]] }
  0x56   :  { %s1883_s21 = sshll.u32 %s1882_s17, 1  ;;  %s1890_s12 = sld [smem:[#allocation4 + $0xb]] }
  0x57   :  { %v2359_v15 = vld [vmem:[#allocation2 + $0x70] sm:$0xff]  ;;  %v2361_v16 = vld [vmem:[#allocation2 + $0x78] sm:$0xff]  ;;  %s149_s23 = scalar_lea.vmem [#allocation7], %s1883_s21  ;;  %s1901_s24 = sshll.u32 %s1900_s18, 1 }
  0x58   :  { %v250_v17 = vsel %vm2347_vm1, %v2355_v13, %v2359_v15  ;;  %v251_v18 = vsel %vm2351_vm2, %v2357_v14, %v2361_v16  ;;  %v150_v44 = vld [vmem:[%s149_s23] sm:$0x3]  ;;  %s1903_s25 = sshll.u32 %s1902_s19, 1  ;;  %s212_s26 = scalar_lea.vmem [#allocation7], %s1901_s24 }
  0x59   :  { %v252_v19 = vmul.f32 0.5, %v250_v17  ;;  %v253_v20 = vmul.f32 0.5, %v251_v18  ;;  %152 = vst.msk [vmem:[#allocation2 + $0x11] ss:$8 sm:$0x3] %vm2331_vm0, %v150_v44  ;;  %s219_s27 = scalar_lea.vmem [#allocation7], %s1903_s25 }
  0x5a   :  { %v213_v46 = vld [vmem:[%s212_s26] sm:$0x3]  ;;  %s1885_s6 = sshll.u32 %s1884_s29, 1  ;;  %s1887_s7 = sshll.u32 %s1886_s30, 1 }
  0x5b   :  { %v255_v21 = vsel %vm78_vm3, %v251_v18, %v253_v20  ;;  %2046 = vtanh.f32 %v252_v19  ;;  %v220_v47 = vld [vmem:[%s219_s27] sm:$0x3]  ;;  %215 = vst.msk [vmem:[#allocation2 + $0x60] ss:$8 sm:$0x3] %vm2331_vm0, %v213_v46  ;;  %s156_s8 = scalar_lea.vmem [#allocation7], %s1885_s6 }
  0x5c   :  { %2048 = vtanh.f32 %v255_v21  ;;  %222 = vst.msk [vmem:[#allocation2 + $0x61] ss:$8 sm:$0x3] %vm2331_vm0, %v220_v47  ;;  %s163_s3 = scalar_lea.vmem [#allocation7], %s1887_s7  ;;  %s1897_s0 = sshll.u32 %s1896_s1, 1 }
  0x5d   :  { %s1899_s28 = sshll.u32 %s1898_s5, 1  ;;  %s198_s9 = scalar_lea.vmem [#allocation7], %s1897_s0 }
  0x5e   :  { %s205_s10 = scalar_lea.vmem [#allocation7], %s1899_s28  ;;  %s1894_s2 = sld [smem:[#allocation4 + $0xc]] }
  0x5f   :  { %s1889_s15 = sshll.u32 %s1888_s11, 1  ;;  %s1891_s17 = sshll.u32 %s1890_s12, 1 }
  0x60   :  { %v2439_v50 = vld [vmem:[#allocation2 + $0x10] sm:$0xff]  ;;  %v2443_v52 = vld [vmem:[#allocation2 + $0x18] sm:$0xff]  ;;  %s170_s18 = scalar_lea.vmem [#allocation7], %s1889_s15  ;;  %s177_s19 = scalar_lea.vmem [#allocation7], %s1891_s17 }
  0x61   :  { %s1893_s20 = sshll.u32 %s1892_s13, 1 }
  0x62   :  { %s184_s22 = scalar_lea.vmem [#allocation7], %s1893_s20 }
  0x63   :  { %v2441_v51 = vld [vmem:[#allocation2 + $0x60] sm:$0xff]  ;;  %v2445_v53 = vld [vmem:[#allocation2 + $0x68] sm:$0xff] }
  0x64   :  { %v285_v54 = vsel %vm2347_vm1, %v2439_v50, %v2441_v51  ;;  %v286_v55 = vsel %vm2351_vm2, %v2443_v52, %v2445_v53  ;;  %s1895_s21 = sshll.u32 %s1894_s2, 1 }
  0x65   :  { %v2047_v22 = vpop.eup %2046  ;;  %s191_s23 = scalar_lea.vmem [#allocation7], %s1895_s21 }
  0x66   :  { %v2049_v23 = vpop.eup %2048  ;;  %v258_v24 = vmul.f32 0.5, %v2047_v22 }
  0x67   :  { %v259_v25 = vmul.f32 0.5, %v2049_v23 }
  0x68   :  { %v260_v26 = vadd.f32 0.5, %v258_v24  ;;  %v164_v24 = vld [vmem:[%s163_s3] sm:$0x3] }
  0x69   :  { %v261_v27 = vadd.f32 0.5, %v259_v25  ;;  %166 = vst.msk [vmem:[#allocation2 + $0x21] ss:$8 sm:$0x3] %vm2331_vm0, %v164_v24 }
  0x6a   :  { %v264_v39 = vmul.f32 0.0, %v260_v26 }
  0x6b   :  { %v263_v28 = vsel %vm78_vm3, %v2049_v23, %v261_v27  ;;  %v157_v23 = vld [vmem:[%s156_s8] sm:$0x3] }
  0x6c   :  { %v265_v29 = vmul.f32 %v263_v28, %v260_v26  ;;  %159 = vst.msk [vmem:[#allocation2 + $0x20] ss:$8 sm:$0x3] %vm2331_vm0, %v157_v23  ;;  %v199_v26 = vld [vmem:[%s198_s9] sm:$0x3] }
  0x6d   :  { %v206_v27 = vld [vmem:[%s205_s10] sm:$0x3]  ;;  %201 = vst.msk [vmem:[#allocation2 + $0x50] ss:$8 sm:$0x3] %vm2331_vm0, %v199_v26 }
  0x6e   :  { %267 = vrot.lane.b32.xlu0 %v265_v29, %s2235_s14  ;;  %208 = vst.msk [vmem:[#allocation2 + $0x51] ss:$8 sm:$0x3] %vm2331_vm0, %v206_v27 }
  0xe0   :  { %v268_v40 = vpop.permute.xlu0 %267 }
  0xe1   :  { %v2413_v41 = vadd.f32 %v268_v40, %v264_v39  ;;  %v2487_v39 = vld [vmem:[#allocation2 + $0x20] sm:$0xff]  ;;  %v2489_v40 = vld [vmem:[#allocation2 + $0x50] sm:$0xff] }
  0xe2   :  { %v409_v43 = vsel %vm2347_vm1, %v2487_v39, %v2489_v40 }
  0xe3   :  { %2050 = vtanh.f32 %v2413_v41 }
  0xed   :  { %v2051_v42 = vpop.eup %2050 }
  0xee   :  { %v2416_v45 = vmul.f32 %v2051_v42, %v263_v28  ;;  %v2493_v42 = vld [vmem:[#allocation2 + $0x58] sm:$0xff] }
  0xf0   :  { %v287_v48 = vpack.c.bf16 %v2416_v45, %v2416_v45 }
  0xf2   :  { %289 = vrot.lane.b32.xlu0 %v287_v48, %s2235_s14 }
 0x164   :  { %v290_v49 = vpop.permute.xlu0 %289 }
 0x165   :  { %1916 = vmatmul.mubr.msk.bf16.vlgmr.msra.gmra.mrb[0].mxu0 %vm331_vm4, %v290_v49 }
 0x166   :  { %502 = vmatpush1.bf16.msra.mxu0 %v2379_v31  ;;  %533 = vmatprep.mubr.bf16.mxu0 %v2236_v34 }
 0x167   :  { %503 = vmatprep.subr.bf16.mxu0 %v2381_v32 }
 0x16a   :  { %504 = vmatpush1.bf16.msra.mxu0 %v2386_v33 }
 0x16b   :  { %505 = vmatprep.subr.bf16.mxu0 %v2390_v35 }
 0x16e   :  { %506 = vmatpush1.bf16.msra.mxu0 %v2396_v36 }
 0x16f   :  { %507 = vmatprep.subr.bf16.mxu0 %v2399_v37 }
 0x172   :  { %508 = vmatpush1.bf16.msra.mxu0 %v2404_v38 }
 0x173   :  { %667 = vmatprep.subr.bf16.mxu0 %v2377_v30 }
 0x238   :  { %v369_v56 = vpop.f32.mrb[0].mxu0 }
 0x239   :  { %v376_v57 = vadd.f32 %v369_v56, %v285_v54  ;;  %v371_v58 = vpop.f32.mrb[1].mxu0 }
 0x23a   :  { %v377_v59 = vadd.f32 %v371_v58, %v286_v55  ;;  %v373_v60 = vpop.f32.mrb[2].mxu0 }
 0x23b   :  { %v378_v61 = vmul.f32 0.5, %v376_v57  ;;  %v374_v62 = vpop.f32.mrb[3].mxu0 }
 0x23c   :  { %v379_v63 = vmul.f32 0.5, %v377_v59 }
 0x23d   :  { %2052 = vtanh.f32 %v378_v61 }
 0x23e   :  { %v381_v2 = vsel %vm78_vm3, %v377_v59, %v379_v63 }
 0x23f   :  { %2054 = vtanh.f32 %v381_v2 }
 0x247   :  { %v2053_v4 = vpop.eup %2052 }
 0x248   :  { %v384_v7 = vmul.f32 0.5, %v2053_v4 }
 0x249   :  { %v2055_v5 = vpop.eup %2054 }
 0x24a   :  { %v385_v8 = vmul.f32 0.5, %v2055_v5  ;;  %v386_v10 = vadd.f32 0.5, %v384_v7 }
 0x24c   :  { %v387_v9 = vadd.f32 0.5, %v385_v8  ;;  %v390_v19 = vmul.f32 %v386_v10, %v2413_v41  ;;  %v2491_v41 = vld [vmem:[#allocation2 + $0x28] sm:$0xff] }
 0x24d   :  { %v410_v44 = vsel %vm2351_vm2, %v2491_v41, %v2493_v42 }
 0x24e   :  { %v389_v17 = vsel %vm78_vm3, %v2055_v5, %v387_v9 }
 0x24f   :  { %v391_v18 = vmul.f32 %v389_v17, %v386_v10 }
 0x251   :  { %393 = vrot.lane.b32.xlu1 %v391_v18, %s2235_s14  ;;  %v178_v18 = vld [vmem:[%s177_s19] sm:$0x3] }
 0x252   :  { %180 = vst.msk [vmem:[#allocation2 + $0x31] ss:$8 sm:$0x3] %vm2331_vm0, %v178_v18 }
 0x2c3   :  { %v394_v20 = vpop.permute.xlu1 %393 }
 0x2c4   :  { %v2461_v21 = vadd.f32 %v394_v20, %v390_v19  ;;  %v185_v20 = vld [vmem:[%s184_s22] sm:$0x3] }
 0x2c5   :  { %187 = vst.msk [vmem:[#allocation2 + $0x40] ss:$8 sm:$0x3] %vm2331_vm0, %v185_v20 }
 0x2c6   :  { %2056 = vtanh.f32 %v2461_v21 }
 0x2d0   :  { %v2057_v22 = vpop.eup %2056 }
 0x2d1   :  { %v2464_v25 = vmul.f32 %v2057_v22, %v389_v17  ;;  %v171_v17 = vld [vmem:[%s170_s18] sm:$0x3] }
 0x2d2   :  { %173 = vst.msk [vmem:[#allocation2 + $0x30] ss:$8 sm:$0x3] %vm2331_vm0, %v171_v17 }
 0x2d3   :  { %v411_v28 = vpack.c.bf16 %v2464_v25, %v2464_v25 }
 0x2d5   :  { %413 = vrot.lane.b32.xlu1 %v411_v28, %s2235_s14 }
 0x2d9   :  { %v488_v3 = vld [vmem:[#allocation2 + $0x30] sm:$0xff]  ;;  %v489_v26 = vld [vmem:[#allocation2 + $0x38] sm:$0xff] }
 0x347   :  { %v414_v29 = vpop.permute.xlu1 %413 }
 0x348   :  { %1917 = vmatmul.mubr.msk.bf16.vlgmr.msra.gmra.mrb[0].mxu1 %vm331_vm4, %v414_v29 }
 0x349   :  { %585 = vmatpush1.bf16.msra.mxu1 %v2379_v31  ;;  %616 = vmatprep.mubr.bf16.mxu1 %v2236_v34 }
 0x34a   :  { %586 = vmatprep.subr.bf16.mxu1 %v2381_v32 }
 0x34d   :  { %587 = vmatpush1.bf16.msra.mxu1 %v2386_v33 }
 0x34e   :  { %588 = vmatprep.subr.bf16.mxu1 %v2390_v35 }
 0x351   :  { %589 = vmatpush1.bf16.msra.mxu1 %v2396_v36 }
 0x352   :  { %590 = vmatprep.subr.bf16.mxu1 %v2399_v37 }
 0x355   :  { %591 = vmatpush1.bf16.msra.mxu1 %v2404_v38 }
 0x356   :  { %750 = vmatprep.subr.bf16.mxu1 %v2377_v30 }
 0x41b   :  { %v452_v46 = vpop.f32.mrb[0].mxu1 }
 0x41c   :  { %v459_v47 = vadd.f32 %v452_v46, %v409_v43  ;;  %v454_v48 = vpop.f32.mrb[1].mxu1 }
 0x41d   :  { %v460_v49 = vadd.f32 %v454_v48, %v410_v44  ;;  %v456_v54 = vpop.f32.mrb[2].mxu1 }
 0x41e   :  { %v461_v55 = vmul.f32 0.5, %v459_v47  ;;  %v457_v56 = vpop.f32.mrb[3].mxu1 }
 0x41f   :  { %v462_v57 = vmul.f32 0.5, %v460_v49 }
 0x420   :  { %2058 = vtanh.f32 %v461_v55 }
 0x421   :  { %v464_v58 = vsel %vm78_vm3, %v460_v49, %v462_v57 }
 0x422   :  { %2060 = vtanh.f32 %v464_v58 }
 0x42a   :  { %v2059_v59 = vpop.eup %2058 }
 0x42b   :  { %v467_v61 = vmul.f32 0.5, %v2059_v59 }
 0x42c   :  { %v2061_v60 = vpop.eup %2060 }
 0x42d   :  { %v468_v62 = vmul.f32 0.5, %v2061_v60  ;;  %v469_v2 = vadd.f32 0.5, %v467_v61 }
 0x42f   :  { %v470_v63 = vadd.f32 0.5, %v468_v62  ;;  %v473_v7 = vmul.f32 %v469_v2, %v2461_v21  ;;  %v192_v21 = vld [vmem:[%s191_s23] sm:$0x3] }
 0x430   :  { %194 = vst.msk [vmem:[#allocation2 + $0x41] ss:$8 sm:$0x3] %vm2331_vm0, %v192_v21 }
 0x431   :  { %v472_v4 = vsel %vm78_vm3, %v2061_v60, %v470_v63 }
 0x432   :  { %v474_v5 = vmul.f32 %v472_v4, %v469_v2 }
 0x434   :  { %476 = vrot.lane.b32.xlu0 %v474_v5, %s2235_s14 }
 0x437   :  { %v490_v24 = vld [vmem:[#allocation2 + $0x40] sm:$0xff]  ;;  %v491_v27 = vld [vmem:[#allocation2 + $0x48] sm:$0xff] }
 0x438   :  { %v492_v28 = vsel %vm2347_vm1, %v488_v3, %v490_v24  ;;  %v493_v29 = vsel %vm2351_vm2, %v489_v26, %v491_v27  ;;  %v576_v18 = vsel %vm2351_vm2, %v491_v27, %v489_v26 }
 0x4a6   :  { %v477_v8 = vpop.permute.xlu0 %476 }
 0x4a7   :  { %v2509_v9 = vadd.f32 %v477_v8, %v473_v7 }
 0x4a9   :  { %2062 = vtanh.f32 %v2509_v9 }
 0x4b3   :  { %v2063_v10 = vpop.eup %2062 }
 0x4b4   :  { %v2512_v19 = vmul.f32 %v2063_v10, %v472_v4 }
 0x4b6   :  { %v494_v22 = vpack.c.bf16 %v2512_v19, %v2512_v19 }
 0x4b8   :  { %496 = vrot.lane.b32.xlu1 %v494_v22, %s2235_s14 }
 0x52a   :  { %v497_v23 = vpop.permute.xlu1 %496 }
 0x52b   :  { %1918 = vmatmul.mubr.msk.bf16.vlgmr.msra.gmra.mrb[4].mxu0 %vm331_vm4, %v497_v23 }
 0x52c   :  { %668 = vmatpush1.bf16.msra.mxu0 %v2379_v31  ;;  %699 = vmatprep.mubr.bf16.mxu0 %v2236_v34 }
 0x52d   :  { %669 = vmatprep.subr.bf16.mxu0 %v2381_v32 }
 0x530   :  { %670 = vmatpush1.bf16.msra.mxu0 %v2386_v33 }
 0x531   :  { %671 = vmatprep.subr.bf16.mxu0 %v2390_v35 }
 0x534   :  { %672 = vmatpush1.bf16.msra.mxu0 %v2396_v36 }
 0x535   :  { %673 = vmatprep.subr.bf16.mxu0 %v2399_v37 }
 0x538   :  { %674 = vmatpush1.bf16.msra.mxu0 %v2404_v38 }
 0x539   :  { %833 = vmatprep.subr.bf16.mxu0 %v2377_v30 }
 0x5fe   :  { %v535_v43 = vpop.f32.mrb[4].mxu0 }
 0x5ff   :  { %v542_v44 = vadd.f32 %v535_v43, %v492_v28  ;;  %v537_v46 = vpop.f32.mrb[5].mxu0 }
 0x600   :  { %v543_v47 = vadd.f32 %v537_v46, %v493_v29  ;;  %v539_v48 = vpop.f32.mrb[6].mxu0 }
 0x601   :  { %v544_v49 = vmul.f32 0.5, %v542_v44  ;;  %v540_v54 = vpop.f32.mrb[7].mxu0 }
 0x602   :  { %v545_v55 = vmul.f32 0.5, %v543_v47 }
 0x603   :  { %2064 = vtanh.f32 %v544_v49 }
 0x604   :  { %v547_v30 = vsel %vm78_vm3, %v543_v47, %v545_v55 }
 0x605   :  { %2066 = vtanh.f32 %v547_v30 }
 0x60d   :  { %v2065_v56 = vpop.eup %2064 }
 0x60e   :  { %v550_v58 = vmul.f32 0.5, %v2065_v56 }
 0x60f   :  { %v2067_v57 = vpop.eup %2066 }
 0x610   :  { %v551_v59 = vmul.f32 0.5, %v2067_v57  ;;  %v552_v61 = vadd.f32 0.5, %v550_v58 }
 0x612   :  { %v553_v60 = vadd.f32 0.5, %v551_v59  ;;  %v556_v2 = vmul.f32 %v552_v61, %v2509_v9  ;;  %v575_v9 = vsel %vm2347_vm1, %v490_v24, %v488_v3 }
 0x614   :  { %v555_v62 = vsel %vm78_vm3, %v2067_v57, %v553_v60 }
 0x615   :  { %v557_v63 = vmul.f32 %v555_v62, %v552_v61  ;;  %v658_v61 = vsel %vm2347_vm1, %v2489_v40, %v2487_v39 }
 0x617   :  { %559 = vrot.lane.b32.xlu0 %v557_v63, %s2235_s14 }
 0x689   :  { %v560_v4 = vpop.permute.xlu0 %559 }
 0x68a   :  { %v562_v5 = vadd.f32 %v560_v4, %v556_v2 }
 0x68c   :  { %2068 = vtanh.f32 %v562_v5 }
 0x696   :  { %v2069_v7 = vpop.eup %2068 }
 0x697   :  { %v2545_v8 = vmul.f32 %v2069_v7, %v555_v62 }
 0x699   :  { %v577_v10 = vpack.c.bf16 %v2545_v8, %v2545_v8 }
 0x69b   :  { %579 = vrot.lane.b32.xlu1 %v577_v10, %s2235_s14 }
 0x70d   :  { %v580_v17 = vpop.permute.xlu1 %579 }
 0x70e   :  { %1919 = vmatmul.mubr.msk.bf16.vlgmr.msra.gmra.mrb[4].mxu1 %vm331_vm4, %v580_v17 }
 0x70f   :  { %751 = vmatpush1.bf16.msra.mxu1 %v2379_v31  ;;  %782 = vmatprep.mubr.bf16.mxu1 %v2236_v34 }
 0x710   :  { %752 = vmatprep.subr.bf16.mxu1 %v2381_v32 }
 0x713   :  { %753 = vmatpush1.bf16.msra.mxu1 %v2386_v33 }
 0x714   :  { %754 = vmatprep.subr.bf16.mxu1 %v2390_v35 }
 0x717   :  { %755 = vmatpush1.bf16.msra.mxu1 %v2396_v36 }
 0x718   :  { %756 = vmatprep.subr.bf16.mxu1 %v2399_v37 }
 0x71b   :  { %757 = vmatpush1.bf16.msra.mxu1 %v2404_v38 }
 0x7e1   :  { %v618_v20 = vpop.f32.mrb[4].mxu1 }
 0x7e2   :  { %v625_v21 = vadd.f32 %v618_v20, %v575_v9  ;;  %v620_v22 = vpop.f32.mrb[5].mxu1 }
 0x7e3   :  { %v626_v23 = vadd.f32 %v620_v22, %v576_v18  ;;  %v622_v28 = vpop.f32.mrb[6].mxu1 }
 0x7e4   :  { %v627_v29 = vmul.f32 0.5, %v625_v21  ;;  %v623_v43 = vpop.f32.mrb[7].mxu1  ;;  %v741_v28 = vsel %vm2347_vm1, %v2441_v51, %v2439_v50 }
 0x7e5   :  { %v628_v44 = vmul.f32 0.5, %v626_v23 }
 0x7e6   :  { %2070 = vtanh.f32 %v627_v29  ;;  %v742_v29 = vsel %vm2351_vm2, %v2445_v53, %v2443_v52 }
 0x7e7   :  { %v630_v46 = vsel %vm78_vm3, %v626_v23, %v628_v44 }
 0x7e8   :  { %2072 = vtanh.f32 %v630_v46 }
 0x7f0   :  { %v2071_v47 = vpop.eup %2070 }
 0x7f1   :  { %v633_v49 = vmul.f32 0.5, %v2071_v47 }
 0x7f2   :  { %v2073_v48 = vpop.eup %2072 }
 0x7f3   :  { %v634_v3 = vmul.f32 0.5, %v2073_v48  ;;  %v635_v54 = vadd.f32 0.5, %v633_v49 }
 0x7f5   :  { %v636_v24 = vadd.f32 0.5, %v634_v3  ;;  %v639_v55 = vmul.f32 %v635_v54, %v562_v5 }
 0x7f7   :  { %v638_v26 = vsel %vm78_vm3, %v2073_v48, %v636_v24 }
 0x7f8   :  { %v640_v27 = vmul.f32 %v638_v26, %v635_v54 }
 0x7fa   :  { %642 = vrot.lane.b32.xlu0 %v640_v27, %s2235_s14 }
 0x86c   :  { %v643_v30 = vpop.permute.xlu0 %642 }
 0x86d   :  { %v645_v56 = vadd.f32 %v643_v30, %v639_v55 }
 0x86f   :  { %2074 = vtanh.f32 %v645_v56 }
 0x879   :  { %v2075_v57 = vpop.eup %2074 }
 0x87a   :  { %v2568_v58 = vmul.f32 %v2075_v57, %v638_v26 }
 0x87c   :  { %v660_v59 = vpack.c.bf16 %v2568_v58, %v2568_v58 }
 0x87e   :  { %662 = vrot.lane.b32.xlu1 %v660_v59, %s2235_s14 }
 0x8f0   :  { %v663_v60 = vpop.permute.xlu1 %662 }
 0x8f1   :  { %1920 = vmatmul.mubr.msk.bf16.vlgmr.msra.gmra.mrb[8].mxu0 %vm331_vm4, %v663_v60 }
 0x8f2   :  { %834 = vmatpush1.bf16.msra.mxu0 %v2379_v31  ;;  %865 = vmatprep.mubr.bf16.mxu0 %v2236_v34  ;;  %v659_v31 = vsel %vm2351_vm2, %v2493_v42, %v2491_v41 }
 0x8f3   :  { %835 = vmatprep.subr.bf16.mxu0 %v2381_v32 }
 0x8f6   :  { %836 = vmatpush1.bf16.msra.mxu0 %v2386_v33 }
 0x8f7   :  { %837 = vmatprep.subr.bf16.mxu0 %v2390_v35 }
 0x8fa   :  { %838 = vmatpush1.bf16.msra.mxu0 %v2396_v36 }
 0x8fb   :  { %839 = vmatprep.subr.bf16.mxu0 %v2399_v37 }
 0x8fe   :  { %840 = vmatpush1.bf16.msra.mxu0 %v2404_v38 }
 0x9c4   :  { %v701_v32 = vpop.f32.mrb[8].mxu0 }
 0x9c5   :  { %v708_v33 = vadd.f32 %v701_v32, %v658_v61  ;;  %v703_v62 = vpop.f32.mrb[9].mxu0 }
 0x9c6   :  { %v709_v35 = vadd.f32 %v703_v62, %v659_v31  ;;  %v705_v63 = vpop.f32.mrb[10].mxu0 }
 0x9c7   :  { %v710_v36 = vmul.f32 0.5, %v708_v33  ;;  %v706_v2 = vpop.f32.mrb[11].mxu0 }
 0x9c8   :  { %v711_v37 = vmul.f32 0.5, %v709_v35 }
 0x9c9   :  { %2076 = vtanh.f32 %v710_v36 }
 0x9ca   :  { %v713_v38 = vsel %vm78_vm3, %v709_v35, %v711_v37 }
 0x9cb   :  { %2078 = vtanh.f32 %v713_v38 }
 0x9d3   :  { %v2077_v4 = vpop.eup %2076 }
 0x9d4   :  { %v716_v40 = vmul.f32 0.5, %v2077_v4 }
 0x9d5   :  { %v2079_v39 = vpop.eup %2078 }
 0x9d6   :  { %v717_v5 = vmul.f32 0.5, %v2079_v39  ;;  %v718_v10 = vadd.f32 0.5, %v716_v40 }
 0x9d8   :  { %v719_v7 = vadd.f32 0.5, %v717_v5  ;;  %v722_v17 = vmul.f32 %v718_v10, %v645_v56 }
 0x9da   :  { %v721_v41 = vsel %vm78_vm3, %v2079_v39, %v719_v7 }
 0x9db   :  { %v723_v42 = vmul.f32 %v721_v41, %v718_v10 }
 0x9dd   :  { %725 = vrot.lane.b32.xlu0 %v723_v42, %s2235_s14  ;;  %v2022_v42 = vld [vmem:[#allocation8 + $0x40] ss:$8 sps:$4 sm:$0xff]  }
 0xa4f   :  { %v726_v9 = vpop.permute.xlu0 %725 }
 0xa50   :  { %v728_v18 = vadd.f32 %v726_v9, %v722_v17  ;;  %v2024_v17 = vld [vmem:[#allocation8 + $0x44] ss:$8 sps:$4 sm:$0xff]   ;;  %v2027_v9 = vld [vmem:[#allocation8 + $0x54] ss:$8 sps:$4 sm:$0xff]  }
 0xa51   :  { %986 = vmatprep.subr.bf16.mxu1 %v2024_v17 }
 0xa52   :  { %2080 = vtanh.f32 %v728_v18 }
 0xa5c   :  { %v2081_v20 = vpop.eup %2080 }
 0xa5d   :  { %v2595_v21 = vmul.f32 %v2081_v20, %v721_v41 }
 0xa5f   :  { %v743_v22 = vpack.c.bf16 %v2595_v21, %v2595_v21 }
 0xa61   :  { %745 = vrot.lane.b32.xlu1 %v743_v22, %s2235_s14 }
 0xad3   :  { %v746_v23 = vpop.permute.xlu1 %745 }
 0xad4   :  { %1921 = vmatmul.mubr.msk.bf16.vlgmr.msra.gmra.mrb[8].mxu1 %vm331_vm4, %v746_v23 }
 0xad5   :  { %1018 = vmatprep.mubr.bf16.mxu1 %v2236_v34  ;;  %987 = vmatpush1.bf16.msra.mxu1 %v2022_v42 }
 0xad6   :  { %988 = vmatprep.subr.bf16.mxu1 %v2027_v9 }
 0xba7   :  { %v784_v43 = vpop.f32.mrb[8].mxu1 }
 0xba8   :  { %v791_v44 = vadd.f32 %v784_v43, %v741_v28  ;;  %v786_v46 = vpop.f32.mrb[9].mxu1  ;;  %v2028_v28 = vld [vmem:[#allocation8 + $0x60] ss:$8 sps:$4 sm:$0xff]  }
 0xba9   :  { %v792_v47 = vadd.f32 %v786_v46, %v742_v29  ;;  %v788_v48 = vpop.f32.mrb[10].mxu1  ;;  %v2030_v29 = vld [vmem:[#allocation8 + $0x64] ss:$8 sps:$4 sm:$0xff]  }
 0xbaa   :  { %v793_v49 = vmul.f32 0.5, %v791_v44  ;;  %v789_v3 = vpop.f32.mrb[11].mxu1  ;;  %v2031_v44 = vld [vmem:[#allocation8 + $0x70] ss:$8 sps:$4 sm:$0xff]  }
 0xbab   :  { %v794_v24 = vmul.f32 0.5, %v792_v47 }
 0xbac   :  { %2082 = vtanh.f32 %v793_v49 }
 0xbad   :  { %v796_v54 = vsel %vm78_vm3, %v792_v47, %v794_v24 }
 0xbae   :  { %2084 = vtanh.f32 %v796_v54 }
 0xbb6   :  { %v2083_v26 = vpop.eup %2082 }
 0xbb7   :  { %v799_v51 = vmul.f32 0.5, %v2083_v26 }
 0xbb8   :  { %v2085_v50 = vpop.eup %2084 }
 0xbb9   :  { %v800_v27 = vmul.f32 0.5, %v2085_v50  ;;  %v801_v30 = vadd.f32 0.5, %v799_v51 }
 0xbbb   :  { %v802_v55 = vadd.f32 0.5, %v800_v27  ;;  %v805_v56 = vmul.f32 %v801_v30, %v728_v18  ;;  %v2025_v18 = vld [vmem:[#allocation8 + $0x50] ss:$8 sps:$4 sm:$0xff]  }
 0xbbc   :  { %989 = vmatpush1.bf16.msra.mxu1 %v2025_v18 }
 0xbbd   :  { %v804_v52 = vsel %vm78_vm3, %v2085_v50, %v802_v55  ;;  %990 = vmatprep.subr.bf16.mxu1 %v2030_v29 }
 0xbbe   :  { %v806_v53 = vmul.f32 %v804_v52, %v801_v30 }
 0xbc0   :  { %808 = vrot.lane.b32.xlu0 %v806_v53, %s2235_s14  ;;  %991 = vmatpush1.bf16.msra.mxu1 %v2028_v28 }
 0xc32   :  { %v809_v57 = vpop.permute.xlu0 %808 }
 0xc33   :  { %v811_v59 = vadd.f32 %v809_v57, %v805_v56  ;;  %v927_v57 = vshrl.u32 %v72_v1, 7 }
 0xc35   :  { %2086 = vtanh.f32 %v811_v59 }
 0xc3f   :  { %v2087_v60 = vpop.eup %2086 }
 0xc40   :  { %v813_v61 = vmul.f32 %v2087_v60, %v804_v52 }
 0xc42   :  { %v826_v31 = vpack.c.bf16 %v813_v61, %v813_v61 }
 0xc44   :  { %828 = vrot.lane.b32.xlu1 %v826_v31, %s2235_s14 }
 0xc48   :  { %274 = vrot.lane.b32.xlu1 %v2416_v45, %s2235_s14 }
 0xc4c   :  { %815 = vrot.lane.b32.xlu1 %v813_v61, %s2235_s14  ;;  %v928_v61 = vsub.s32 0, %v927_v57 }
 0xc50   :  { %483 = vrot.lane.b32.xlu1 %v2512_v19, %s2235_s14  ;;  %v824_v19 = vsel %vm2347_vm1, %v2359_v15, %v2355_v13 }
 0xc54   :  { %649 = vrot.lane.b32.xlu1 %v2568_v58, %s2235_s14  ;;  %v825_v58 = vsel %vm2351_vm2, %v2361_v16, %v2357_v14 }
 0xcb6   :  { %v829_v32 = vpop.permute.xlu1 %828 }
 0xcb7   :  { %1922 = vmatmul.mubr.msk.bf16.vlgmr.msra.gmra.mrb[12].mxu0 %vm331_vm4, %v829_v32 }
 0xcb8   :  { %1195 = vmatprep.mubr.bf16.mxu0 %v2236_v34 }
 0xcba   :  { %v275_v33 = vpop.permute.xlu1 %274 }
 0xcbb   :  { %278 = vst.msk [vmem:[#allocation3] sm:$0xff] %vm277_vm5, %v275_v33 }
 0xcbc   :  { %280 = vst.msk [vmem:[#allocation3 + $0x38] sm:$0xff] %vm279_vm6, %v275_v33 }
 0xcbe   :  { %v816_v45 = vpop.permute.xlu1 %815 }
 0xcc2   :  { %v484_v62 = vpop.permute.xlu1 %483 }
 0xcc3   :  { %486 = vst.msk [vmem:[#allocation3 + $0x10] sm:$0xff] %vm277_vm5, %v484_v62 }
 0xcc4   :  { %487 = vst.msk [vmem:[#allocation3 + $0x28] sm:$0xff] %vm279_vm6, %v484_v62 }
 0xcc6   :  { %v650_v3 = vpop.permute.xlu1 %649 }
 0xd8a   :  { %v867_v35 = vpop.f32.mrb[12].mxu0 }
 0xd8b   :  { %v874_v63 = vadd.f32 %v867_v35, %v824_v19  ;;  %v869_v36 = vpop.f32.mrb[13].mxu0 }
 0xd8c   :  { %v875_v2 = vadd.f32 %v869_v36, %v825_v58  ;;  %v871_v37 = vpop.f32.mrb[14].mxu0 }
 0xd8d   :  { %v876_v38 = vmul.f32 0.5, %v874_v63  ;;  %v872_v4 = vpop.f32.mrb[15].mxu0 }
 0xd8e   :  { %v877_v39 = vmul.f32 0.5, %v875_v2 }
 0xd8f   :  { %2088 = vtanh.f32 %v876_v38 }
 0xd90   :  { %v879_v40 = vsel %vm78_vm3, %v875_v2, %v877_v39 }
 0xd91   :  { %2090 = vtanh.f32 %v879_v40 }
 0xd99   :  { %v2089_v5 = vpop.eup %2088 }
 0xd9a   :  { %v882_v15 = vmul.f32 0.5, %v2089_v5 }
 0xd9b   :  { %v2091_v13 = vpop.eup %2090 }
 0xd9c   :  { %v883_v7 = vmul.f32 0.5, %v2091_v13  ;;  %v884_v41 = vadd.f32 0.5, %v882_v15 }
 0xd9e   :  { %v885_v10 = vadd.f32 0.5, %v883_v7  ;;  %v888_v20 = vmul.f32 %v884_v41, %v811_v59  ;;  %v911_v59 = vld [vmem:[#allocation8 + $0xc0] sm:$0x11] }
 0xd9f   :  { %v912_v60 = vunpack.c.l.bf16 %v911_v59  ;;  %v913_v31 = vunpack.c.h.bf16 %v911_v59 }
 0xda0   :  { %v887_v14 = vsel %vm78_vm3, %v2091_v13, %v885_v10 }
 0xda1   :  { %v889_v16 = vmul.f32 %v887_v14, %v884_v41  ;;  %v929_v32 = vrot.slane %v912_v60, %v928_v61  ;;  %v933_v33 = vrot.slane %v913_v31, %v928_v61 }
 0xda3   :  { %891 = vrot.lane.b32.xlu0 %v889_v16, %s2235_s14 }
 0xda7   :  { %400 = vrot.lane.b32.xlu0 %v2464_v25, %s2235_s14  ;;  %v2033_v25 = vld [vmem:[#allocation8 + $0x74] ss:$8 sps:$4 sm:$0xff]  }
 0xda8   :  { %992 = vmatprep.subr.bf16.mxu1 %v2033_v25 }
 0xda9   :  { %993 = vmatpush1.bf16.msra.mxu1 %v2031_v44 }
 0xe15   :  { %v892_v22 = vpop.permute.xlu0 %891 }
 0xe16   :  { %v894_v23 = vadd.f32 %v892_v22, %v888_v20 }
 0xe18   :  { %2092 = vtanh.f32 %v894_v23 }
 0xe19   :  { %v401_v43 = vpop.permute.xlu0 %400 }
 0xe1a   :  { %403 = vst.msk [vmem:[#allocation3 + $0x8] sm:$0xff] %vm277_vm5, %v401_v43 }
 0xe1b   :  { %404 = vst.msk [vmem:[#allocation3 + $0x30] sm:$0xff] %vm279_vm6, %v401_v43  ;;  %819 = vst.msk [vmem:[#allocation3 + $0x8] sm:$0xff] %vm279_vm6, %v816_v45 }
 0xe1c   :  { %818 = vst.msk [vmem:[#allocation3 + $0x30] sm:$0xff] %vm277_vm5, %v816_v45 }
 0xe22   :  { %v2093_v46 = vpop.eup %2092  ;;  %v915_v54 = vld [vmem:[#allocation3 + $0x8] sm:$0xff] }
 0xe23   :  { %v896_v47 = vmul.f32 %v2093_v46, %v887_v14  ;;  %v920_v53 = vld [vmem:[#allocation3 + $0x30] sm:$0xff] }
 0xe25   :  { %898 = vrot.lane.b32.xlu0 %v896_v47, %s2235_s14 }
 0xe29   :  { %566 = vrot.lane.b32.xlu0 %v2545_v8, %s2235_s14 }
 0xe2d   :  { %732 = vrot.lane.b32.xlu0 %v2595_v21, %s2235_s14 }
 0xe97   :  { %v899_v48 = vpop.permute.xlu0 %898 }
 0xe98   :  { %901 = vst.msk [vmem:[#allocation3 + $0x38] sm:$0xff] %vm277_vm5, %v899_v48 }
 0xe99   :  { %902 = vst.msk [vmem:[#allocation3] sm:$0xff] %vm279_vm6, %v899_v48 }
 0xe9b   :  { %v567_v49 = vpop.permute.xlu0 %566 }
 0xe9c   :  { %569 = vst.msk [vmem:[#allocation3 + $0x18] sm:$0xff] %vm277_vm5, %v567_v49 }
 0xe9d   :  { %570 = vst.msk [vmem:[#allocation3 + $0x20] sm:$0xff] %vm279_vm6, %v567_v49  ;;  %653 = vst.msk [vmem:[#allocation3 + $0x18] sm:$0xff] %vm279_vm6, %v650_v3 }
 0xe9e   :  { %652 = vst.msk [vmem:[#allocation3 + $0x20] sm:$0xff] %vm277_vm5, %v650_v3 }
 0xe9f   :  { %v733_v24 = vpop.permute.xlu0 %732  ;;  %v921_v52 = vld [vmem:[#allocation3 + $0x38] sm:$0xff] }
 0xea0   :  { %v914_v8 = vld [vmem:[#allocation3] sm:$0xff]  ;;  %735 = vst.msk [vmem:[#allocation3 + $0x28] sm:$0xff] %vm277_vm5, %v733_v24  ;;  %v925_v56 = vpack.c.bf16 %v921_v52, %v920_v53 }
 0xea1   :  { %736 = vst.msk [vmem:[#allocation3 + $0x10] sm:$0xff] %vm279_vm6, %v733_v24  ;;  %v922_v21 = vpack.c.bf16 %v915_v54, %v914_v8 }
 0xea3   :  { %1931 = vmatmul.mubr.msk.bf16.vlgmr.msra.gmra.mrb[12].mxu1 %vm331_vm4, %v922_v21 }
 0xea4   :  { %1028 = vmatprep.mubr.bf16.mxu1 %v2236_v34  ;;  %v917_v50 = vld [vmem:[#allocation3 + $0x18] sm:$0xff] }
 0xea5   :  { %v918_v55 = vld [vmem:[#allocation3 + $0x20] sm:$0xff] }
 0xea7   :  { %v919_v27 = vld [vmem:[#allocation3 + $0x28] sm:$0xff] }
 0xea8   :  { %v916_v26 = vld [vmem:[#allocation3 + $0x10] sm:$0xff]  ;;  %v924_v30 = vpack.c.bf16 %v919_v27, %v918_v55 }
 0xea9   :  { %v923_v51 = vpack.c.bf16 %v917_v50, %v916_v26 }
 0xeab   :  { %1932 = vmatmul.mubr.msk.bf16.gmra.mrb[16].mxu1 %vm331_vm4, %v923_v51 }
 0xeac   :  { %1038 = vmatprep.mubr.bf16.mxu1 %v2236_v34 }
 0xeb3   :  { %1933 = vmatmul.mubr.msk.bf16.gmra.mrb[20].mxu1 %vm331_vm4, %v924_v30 }
 0xeb4   :  { %1048 = vmatprep.mubr.bf16.mxu1 %v2236_v34 }
 0xebb   :  { %1934 = vmatmul.mubr.msk.bf16.gmra.mrb[24].mxu1 %vm331_vm4, %v925_v56 }
 0xebc   :  { %1349 = vmatprep.mubr.bf16.mxu1 %v2236_v34 }
 0xf76   :  { %v1020_v45 = vpop.f32.mrb[12].mxu1 }
 0xf77   :  { %v2670_v62 = vadd.f32 %v1020_v45, %v929_v32  ;;  %v1022_v19 = vpop.f32.mrb[13].mxu1  ;;  %v2787_v45 = vld [vmem:[#allocation8 + $0x84] ss:$8 sps:$4 sm:$0xff]  }
 0xf78   :  { %v2672_v58 = vadd.f32 %v1022_v19, %v933_v33  ;;  %v1024_v35 = vpop.f32.mrb[14].mxu1  ;;  %v2789_v19 = vld [vmem:[#allocation8 + $0x80] ss:$8 sps:$4 sm:$0xff]   ;;  %1163 = vmatprep.subr.bf16.mxu0 %v2787_v45  ;;  %1317 = vmatprep.subr.bf16.mxu1 %v2787_v45 }
 0xf79   :  { %1059 = vst [vmem:[#allocation2] sm:$0xff] %v2670_v62  ;;  %v2675_v63 = vadd.f32 %v1024_v35, %v929_v32  ;;  %v1026_v36 = vpop.f32.mrb[15].mxu1  ;;  %v2791_v35 = vld [vmem:[#allocation8 + $0x94] ss:$8 sps:$4 sm:$0xff]   ;;  %1164 = vmatpush1.bf16.msra.mxu0 %v2789_v19  ;;  %1318 = vmatpush1.bf16.msra.mxu1 %v2789_v19 }
 0xf7a   :  { %1060 = vst [vmem:[#allocation2 + $0x8] sm:$0xff] %v2672_v58  ;;  %v2678_v1 = vadd.f32 %v1026_v36, %v933_v33  ;;  %v2796_v36 = vld [vmem:[#allocation8 + $0x90] ss:$8 sps:$4 sm:$0xff]   ;;  %1165 = vmatprep.subr.bf16.mxu0 %v2791_v35  ;;  %1319 = vmatprep.subr.bf16.mxu1 %v2791_v35 }
 0xf7b   :  { %1061 = vst [vmem:[#allocation2 + $0x10] sm:$0xff] %v2675_v63 }
 0xf7c   :  { %1062 = vst [vmem:[#allocation2 + $0x18] sm:$0xff] %v2678_v1 }
 0xf7d   :  { %1166 = vmatpush1.bf16.msra.mxu0 %v2796_v36  ;;  %1320 = vmatpush1.bf16.msra.mxu1 %v2796_v36 }
 0xf7e   :  { %v1030_v2 = vpop.f32.mrb[16].mxu1 }
 0xf7f   :  { %v2682_v37 = vadd.f32 %v1030_v2, %v929_v32  ;;  %v1032_v38 = vpop.f32.mrb[17].mxu1  ;;  %v2800_v2 = vld [vmem:[#allocation8 + $0xa4] ss:$8 sps:$4 sm:$0xff]  }
 0xf80   :  { %v2684_v4 = vadd.f32 %v1032_v38, %v933_v33  ;;  %v1034_v39 = vpop.f32.mrb[18].mxu1  ;;  %v2804_v38 = vld [vmem:[#allocation8 + $0xa0] ss:$8 sps:$4 sm:$0xff]   ;;  %1167 = vmatprep.subr.bf16.mxu0 %v2800_v2  ;;  %1321 = vmatprep.subr.bf16.mxu1 %v2800_v2 }
 0xf81   :  { %1063 = vst [vmem:[#allocation2 + $0x20] sm:$0xff] %v2682_v37  ;;  %v2687_v40 = vadd.f32 %v1034_v39, %v929_v32  ;;  %v1036_v5 = vpop.f32.mrb[19].mxu1  ;;  %v2808_v39 = vld [vmem:[#allocation8 + $0xb4] ss:$8 sps:$4 sm:$0xff]   ;;  %1168 = vmatpush1.bf16.msra.mxu0 %v2804_v38  ;;  %1322 = vmatpush1.bf16.msra.mxu1 %v2804_v38 }
 0xf82   :  { %1064 = vst [vmem:[#allocation2 + $0x28] sm:$0xff] %v2684_v4  ;;  %v2690_v13 = vadd.f32 %v1036_v5, %v933_v33  ;;  %v2812_v5 = vld [vmem:[#allocation8 + $0xb0] ss:$8 sps:$4 sm:$0xff]   ;;  %1169 = vmatprep.subr.bf16.mxu0 %v2808_v39  ;;  %1323 = vmatprep.subr.bf16.mxu1 %v2808_v39 }
 0xf83   :  { %1065 = vst [vmem:[#allocation2 + $0x30] sm:$0xff] %v2687_v40 }
 0xf84   :  { %1066 = vst [vmem:[#allocation2 + $0x38] sm:$0xff] %v2690_v13 }
 0xf85   :  { %1170 = vmatpush1.bf16.msra.mxu0 %v2812_v5  ;;  %1324 = vmatpush1.bf16.msra.mxu1 %v2812_v5 }
 0xf86   :  { %v1040_v15 = vpop.f32.mrb[20].mxu1  ;;  %1240 = vmatprep.subr.bf16.mxu0 %v2787_v45  ;;  %1463 = vmatprep.subr.bf16.mxu1 %v2787_v45 }
 0xf87   :  { %v2694_v7 = vadd.f32 %v1040_v15, %v929_v32  ;;  %v1042_v10 = vpop.f32.mrb[21].mxu1 }
 0xf88   :  { %v2696_v41 = vadd.f32 %v1042_v10, %v933_v33  ;;  %v1044_v14 = vpop.f32.mrb[22].mxu1 }
 0xf89   :  { %1067 = vst [vmem:[#allocation2 + $0x40] sm:$0xff] %v2694_v7  ;;  %v2699_v16 = vadd.f32 %v1044_v14, %v929_v32  ;;  %v1046_v42 = vpop.f32.mrb[23].mxu1  ;;  %v1308_v17 = vsel %vm2347_vm1, %v2687_v40, %v2694_v7  ;;  %v1381_v9 = vsel %vm2347_vm1, %v2694_v7, %v2687_v40 }
 0xf8a   :  { %1068 = vst [vmem:[#allocation2 + $0x48] sm:$0xff] %v2696_v41  ;;  %v2710_v18 = vadd.f32 %v1046_v42, %v933_v33  ;;  %v1309_v20 = vsel %vm2351_vm2, %v2690_v13, %v2696_v41  ;;  %v1382_v22 = vsel %vm2351_vm2, %v2696_v41, %v2690_v13 }
 0xf8b   :  { %1069 = vst [vmem:[#allocation2 + $0x50] sm:$0xff] %v2699_v16  ;;  %v1231_v23 = vsel %vm2347_vm1, %v2682_v37, %v2699_v16  ;;  %v1454_v28 = vsel %vm2347_vm1, %v2699_v16, %v2682_v37 }
 0xf8c   :  { %1070 = vst [vmem:[#allocation2 + $0x58] sm:$0xff] %v2710_v18  ;;  %v1232_v29 = vsel %vm2351_vm2, %v2684_v4, %v2710_v18  ;;  %v1455_v43 = vsel %vm2351_vm2, %v2710_v18, %v2684_v4 }
 0xf8e   :  { %v1050_v25 = vpop.f32.mrb[24].mxu1 }
 0xf8f   :  { %v2738_v44 = vadd.f32 %v1050_v25, %v929_v32  ;;  %v1052_v46 = vpop.f32.mrb[25].mxu1 }
 0xf90   :  { %v2740_v47 = vadd.f32 %v1052_v46, %v933_v33  ;;  %v1054_v48 = vpop.f32.mrb[26].mxu1 }
 0xf91   :  { %1071 = vst [vmem:[#allocation2 + $0x60] sm:$0xff] %v2738_v44  ;;  %v2743_v49 = vadd.f32 %v1054_v48, %v929_v32  ;;  %v1056_v3 = vpop.f32.mrb[27].mxu1  ;;  %v1114_v24 = vsel %vm2347_vm1, %v2675_v63, %v2738_v44  ;;  %v1527_v8 = vsel %vm2347_vm1, %v2738_v44, %v2675_v63 }
 0xf92   :  { %1072 = vst [vmem:[#allocation2 + $0x68] sm:$0xff] %v2740_v47  ;;  %v2754_v54 = vadd.f32 %v1056_v3, %v933_v33  ;;  %v1115_v21 = vsel %vm2351_vm2, %v2678_v1, %v2740_v47  ;;  %v1528_v26 = vsel %vm2351_vm2, %v2740_v47, %v2678_v1  ;;  %v1677_v47 = vld [vmem:[#allocation10 + $0x20] sm:$0xff] }
 0xf93   :  { %1073 = vst [vmem:[#allocation2 + $0x70] sm:$0xff] %v2743_v49  ;;  %v1087_v50 = vsel %vm2347_vm1, %v2670_v62, %v2743_v49  ;;  %v1600_v51 = vsel %vm2347_vm1, %v2743_v49, %v2670_v62 }
 0xf94   :  { %1074 = vst [vmem:[#allocation2 + $0x78] sm:$0xff] %v2754_v54  ;;  %v1088_v27 = vsel %vm2351_vm2, %v2672_v58, %v2754_v54  ;;  %v1089_v55 = vmul.f32 0.5, %v1087_v50  ;;  %v1601_v30 = vsel %vm2351_vm2, %v2754_v54, %v2672_v58 }
 0xf95   :  { %v1090_v52 = vmul.f32 0.5, %v1088_v27 }
 0xf96   :  { %2094 = vtanh.f32 %v1089_v55 }
 0xf97   :  { %v1092_v53 = vsel %vm78_vm3, %v1088_v27, %v1090_v52 }
 0xf98   :  { %2096 = vtanh.f32 %v1092_v53 }
 0xfa0   :  { %v2095_v56 = vpop.eup %2094 }
 0xfa1   :  { %v1095_v59 = vmul.f32 0.5, %v2095_v56 }
 0xfa2   :  { %v2097_v57 = vpop.eup %2096 }
 0xfa3   :  { %v1096_v60 = vmul.f32 0.5, %v2097_v57  ;;  %v1097_v31 = vadd.f32 0.5, %v1095_v59 }
 0xfa5   :  { %v1098_v61 = vadd.f32 0.5, %v1096_v60  ;;  %v1101_v15 = vmul.f32 0.0, %v1097_v31 }
 0xfa7   :  { %v1100_v32 = vsel %vm78_vm3, %v2097_v57, %v1098_v61 }
 0xfa8   :  { %v1102_v33 = vmul.f32 %v1100_v32, %v1097_v31 }
 0xfaa   :  { %1104 = vrot.lane.b32.xlu1 %v1102_v33, %s2235_s14 }
0x101c   :  { %v1105_v10 = vpop.permute.xlu1 %1104 }
0x101d   :  { %v1107_v14 = vadd.f32 %v1105_v10, %v1101_v15 }
0x101f   :  { %2098 = vtanh.f32 %v1107_v14 }
0x1029   :  { %v2099_v42 = vpop.eup %2098 }
0x102a   :  { %v2821_v25 = vmul.f32 %v2099_v42, %v1100_v32 }
0x102c   :  { %v1116_v46 = vpack.c.bf16 %v2821_v25, %v2821_v25 }
0x102e   :  { %1118 = vrot.lane.b32.xlu0 %v1116_v46, %s2235_s14 }
0x10a0   :  { %v1119_v48 = vpop.permute.xlu0 %1118 }
0x10a1   :  { %1943 = vmatmul.mubr.msk.bf16.vlgmr.msra.gmra.mrb[16].mxu0 %vm331_vm4, %v1119_v48 }
0x10a2   :  { %1241 = vmatpush1.bf16.msra.mxu0 %v2789_v19  ;;  %1272 = vmatprep.mubr.bf16.mxu0 %v2236_v34 }
0x10a3   :  { %1242 = vmatprep.subr.bf16.mxu0 %v2791_v35 }
0x10a6   :  { %1243 = vmatpush1.bf16.msra.mxu0 %v2796_v36 }
0x10a7   :  { %1244 = vmatprep.subr.bf16.mxu0 %v2800_v2 }
0x10aa   :  { %1245 = vmatpush1.bf16.msra.mxu0 %v2804_v38 }
0x10ab   :  { %1246 = vmatprep.subr.bf16.mxu0 %v2808_v39 }
0x10ae   :  { %1247 = vmatpush1.bf16.msra.mxu0 %v2812_v5 }
0x10af   :  { %1390 = vmatprep.subr.bf16.mxu0 %v2787_v45 }
0x1174   :  { %v1197_v3 = vpop.f32.mrb[16].mxu0 }
0x1175   :  { %v1204_v50 = vadd.f32 %v1197_v3, %v1114_v24  ;;  %v1199_v27 = vpop.f32.mrb[17].mxu0 }
0x1176   :  { %v1205_v55 = vadd.f32 %v1199_v27, %v1115_v21  ;;  %v1201_v52 = vpop.f32.mrb[18].mxu0 }
0x1177   :  { %v1206_v53 = vmul.f32 0.5, %v1204_v50  ;;  %v1202_v56 = vpop.f32.mrb[19].mxu0 }
0x1178   :  { %v1207_v57 = vmul.f32 0.5, %v1205_v55 }
0x1179   :  { %2100 = vtanh.f32 %v1206_v53 }
0x117a   :  { %v1209_v59 = vsel %vm78_vm3, %v1205_v55, %v1207_v57 }
0x117b   :  { %2102 = vtanh.f32 %v1209_v59 }
0x1183   :  { %v2101_v60 = vpop.eup %2100 }
0x1184   :  { %v1212_v31 = vmul.f32 0.5, %v2101_v60 }
0x1185   :  { %v2103_v61 = vpop.eup %2102 }
0x1186   :  { %v1213_v24 = vmul.f32 0.5, %v2103_v61  ;;  %v1214_v33 = vadd.f32 0.5, %v1212_v31 }
0x1188   :  { %v1215_v32 = vadd.f32 0.5, %v1213_v24  ;;  %v1218_v21 = vmul.f32 %v1214_v33, %v1107_v14 }
0x118a   :  { %v1217_v15 = vsel %vm78_vm3, %v2103_v61, %v1215_v32 }
0x118b   :  { %v1219_v10 = vmul.f32 %v1217_v15, %v1214_v33 }
0x118d   :  { %1221 = vrot.lane.b32.xlu1 %v1219_v10, %s2235_s14 }
0x11ff   :  { %v1222_v42 = vpop.permute.xlu1 %1221 }
0x1200   :  { %v1224_v46 = vadd.f32 %v1222_v42, %v1218_v21 }
0x1202   :  { %2104 = vtanh.f32 %v1224_v46 }
0x120c   :  { %v2105_v48 = vpop.eup %2104 }
0x120d   :  { %v1226_v3 = vmul.f32 %v2105_v48, %v1217_v15 }
0x120f   :  { %v1233_v50 = vpack.c.bf16 %v1226_v3, %v1226_v3 }
0x1211   :  { %1235 = vrot.lane.b32.xlu0 %v1233_v50, %s2235_s14 }
0x1283   :  { %v1236_v27 = vpop.permute.xlu0 %1235 }
0x1284   :  { %1944 = vmatmul.mubr.msk.bf16.vlgmr.msra.gmra.mrb[20].mxu0 %vm331_vm4, %v1236_v27 }
0x1285   :  { %1391 = vmatpush1.bf16.msra.mxu0 %v2789_v19  ;;  %1422 = vmatprep.mubr.bf16.mxu0 %v2236_v34 }
0x1286   :  { %1392 = vmatprep.subr.bf16.mxu0 %v2791_v35 }
0x1289   :  { %1393 = vmatpush1.bf16.msra.mxu0 %v2796_v36 }
0x128a   :  { %1394 = vmatprep.subr.bf16.mxu0 %v2800_v2 }
0x128d   :  { %1395 = vmatpush1.bf16.msra.mxu0 %v2804_v38 }
0x128e   :  { %1396 = vmatprep.subr.bf16.mxu0 %v2808_v39 }
0x1291   :  { %1397 = vmatpush1.bf16.msra.mxu0 %v2812_v5 }
0x1292   :  { %1536 = vmatprep.subr.bf16.mxu0 %v2787_v45 }
0x1357   :  { %v1274_v14 = vpop.f32.mrb[20].mxu0 }
0x1358   :  { %v1281_v55 = vadd.f32 %v1274_v14, %v1231_v23  ;;  %v1276_v52 = vpop.f32.mrb[21].mxu0 }
0x1359   :  { %v1282_v53 = vadd.f32 %v1276_v52, %v1232_v29  ;;  %v1278_v56 = vpop.f32.mrb[22].mxu0 }
0x135a   :  { %v1283_v57 = vmul.f32 0.5, %v1281_v55  ;;  %v1279_v59 = vpop.f32.mrb[23].mxu0 }
0x135b   :  { %v1284_v60 = vmul.f32 0.5, %v1282_v53 }
0x135c   :  { %2106 = vtanh.f32 %v1283_v57 }
0x135d   :  { %v1286_v61 = vsel %vm78_vm3, %v1282_v53, %v1284_v60 }
0x135e   :  { %2108 = vtanh.f32 %v1286_v61 }
0x1366   :  { %v2107_v31 = vpop.eup %2106 }
0x1367   :  { %v1289_v32 = vmul.f32 0.5, %v2107_v31 }
0x1368   :  { %v2109_v24 = vpop.eup %2108 }
0x1369   :  { %v1290_v23 = vmul.f32 0.5, %v2109_v24  ;;  %v1291_v15 = vadd.f32 0.5, %v1289_v32 }
0x136b   :  { %v1292_v33 = vadd.f32 0.5, %v1290_v23  ;;  %v1295_v29 = vmul.f32 %v1291_v15, %v1224_v46 }
0x136d   :  { %v1294_v10 = vsel %vm78_vm3, %v2109_v24, %v1292_v33 }
0x136e   :  { %v1296_v21 = vmul.f32 %v1294_v10, %v1291_v15 }
0x1370   :  { %1298 = vrot.lane.b32.xlu1 %v1296_v21, %s2235_s14 }
0x13e2   :  { %v1299_v42 = vpop.permute.xlu1 %1298 }
0x13e3   :  { %v1301_v48 = vadd.f32 %v1299_v42, %v1295_v29 }
0x13e5   :  { %2110 = vtanh.f32 %v1301_v48 }
0x13ef   :  { %v2111_v3 = vpop.eup %2110 }
0x13f0   :  { %v1303_v50 = vmul.f32 %v2111_v3, %v1294_v10 }
0x13f2   :  { %v1310_v27 = vpack.c.bf16 %v1303_v50, %v1303_v50 }
0x13f4   :  { %1312 = vrot.lane.b32.xlu0 %v1310_v27, %s2235_s14 }
0x1466   :  { %v1313_v14 = vpop.permute.xlu0 %1312 }
0x1467   :  { %1945 = vmatmul.mubr.msk.bf16.vlgmr.msra.gmra.mrb[28].mxu1 %vm331_vm4, %v1313_v14 }
0x1468   :  { %1464 = vmatpush1.bf16.msra.mxu1 %v2789_v19  ;;  %1495 = vmatprep.mubr.bf16.mxu1 %v2236_v34 }
0x1469   :  { %1465 = vmatprep.subr.bf16.mxu1 %v2791_v35 }
0x146c   :  { %1466 = vmatpush1.bf16.msra.mxu1 %v2796_v36 }
0x146d   :  { %1467 = vmatprep.subr.bf16.mxu1 %v2800_v2 }
0x1470   :  { %1468 = vmatpush1.bf16.msra.mxu1 %v2804_v38 }
0x1471   :  { %1469 = vmatprep.subr.bf16.mxu1 %v2808_v39 }
0x1474   :  { %1470 = vmatpush1.bf16.msra.mxu1 %v2812_v5 }
0x1475   :  { %1609 = vmatprep.subr.bf16.mxu1 %v2787_v45 }
0x153a   :  { %v1351_v46 = vpop.f32.mrb[28].mxu1 }
0x153b   :  { %v1358_v55 = vadd.f32 %v1351_v46, %v1308_v17  ;;  %v1353_v52 = vpop.f32.mrb[29].mxu1 }
0x153c   :  { %v1359_v53 = vadd.f32 %v1353_v52, %v1309_v20  ;;  %v1355_v56 = vpop.f32.mrb[30].mxu1 }
0x153d   :  { %v1360_v57 = vmul.f32 0.5, %v1358_v55  ;;  %v1356_v59 = vpop.f32.mrb[31].mxu1 }
0x153e   :  { %v1361_v60 = vmul.f32 0.5, %v1359_v53 }
0x153f   :  { %2112 = vtanh.f32 %v1360_v57 }
0x1540   :  { %v1363_v45 = vsel %vm78_vm3, %v1359_v53, %v1361_v60 }
0x1541   :  { %2114 = vtanh.f32 %v1363_v45 }
0x1549   :  { %v2113_v61 = vpop.eup %2112 }
0x154a   :  { %v1366_v24 = vmul.f32 0.5, %v2113_v61 }
0x154b   :  { %v2115_v31 = vpop.eup %2114 }
0x154c   :  { %v1367_v17 = vmul.f32 0.5, %v2115_v31  ;;  %v1368_v23 = vadd.f32 0.5, %v1366_v24 }
0x154e   :  { %v1369_v32 = vadd.f32 0.5, %v1367_v17  ;;  %v1372_v20 = vmul.f32 %v1368_v23, %v1301_v48 }
0x1550   :  { %v1371_v33 = vsel %vm78_vm3, %v2115_v31, %v1369_v32 }
0x1551   :  { %v1373_v15 = vmul.f32 %v1371_v33, %v1368_v23 }
0x1553   :  { %1375 = vrot.lane.b32.xlu1 %v1373_v15, %s2235_s14 }
0x15c5   :  { %v1376_v10 = vpop.permute.xlu1 %1375 }
0x15c6   :  { %v1378_v21 = vadd.f32 %v1376_v10, %v1372_v20 }
0x15c8   :  { %2116 = vtanh.f32 %v1378_v21 }
0x15d2   :  { %v2117_v29 = vpop.eup %2116 }
0x15d3   :  { %v1380_v42 = vmul.f32 %v2117_v29, %v1371_v33 }
0x15d5   :  { %v1383_v3 = vpack.c.bf16 %v1380_v42, %v1380_v42 }
0x15d7   :  { %1385 = vrot.lane.b32.xlu0 %v1383_v3, %s2235_s14 }
0x1649   :  { %v1386_v50 = vpop.permute.xlu0 %1385 }
0x164a   :  { %1946 = vmatmul.mubr.msk.bf16.vlgmr.msra.gmra.mrb[24].mxu0 %vm331_vm4, %v1386_v50 }
0x164b   :  { %1537 = vmatpush1.bf16.msra.mxu0 %v2789_v19  ;;  %1568 = vmatprep.mubr.bf16.mxu0 %v2236_v34 }
0x164c   :  { %1538 = vmatprep.subr.bf16.mxu0 %v2791_v35 }
0x164f   :  { %1539 = vmatpush1.bf16.msra.mxu0 %v2796_v36 }
0x1650   :  { %1540 = vmatprep.subr.bf16.mxu0 %v2800_v2 }
0x1653   :  { %1541 = vmatpush1.bf16.msra.mxu0 %v2804_v38 }
0x1654   :  { %1542 = vmatprep.subr.bf16.mxu0 %v2808_v39 }
0x1657   :  { %1543 = vmatpush1.bf16.msra.mxu0 %v2812_v5 }
0x171d   :  { %v1424_v48 = vpop.f32.mrb[24].mxu0 }
0x171e   :  { %v1431_v27 = vadd.f32 %v1424_v48, %v1381_v9  ;;  %v1426_v14 = vpop.f32.mrb[25].mxu0 }
0x171f   :  { %v1432_v46 = vadd.f32 %v1426_v14, %v1382_v22  ;;  %v1428_v55 = vpop.f32.mrb[26].mxu0 }
0x1720   :  { %v1433_v52 = vmul.f32 0.5, %v1431_v27  ;;  %v1429_v53 = vpop.f32.mrb[27].mxu0 }
0x1721   :  { %v1434_v56 = vmul.f32 0.5, %v1432_v46 }
0x1722   :  { %2118 = vtanh.f32 %v1433_v52 }
0x1723   :  { %v1436_v57 = vsel %vm78_vm3, %v1432_v46, %v1434_v56 }
0x1724   :  { %2120 = vtanh.f32 %v1436_v57 }
0x172c   :  { %v2119_v59 = vpop.eup %2118 }
0x172d   :  { %v1439_v40 = vmul.f32 0.5, %v2119_v59 }
0x172e   :  { %v2121_v60 = vpop.eup %2120 }
0x172f   :  { %v1440_v7 = vmul.f32 0.5, %v2121_v60  ;;  %v1441_v45 = vadd.f32 0.5, %v1439_v40 }
0x1731   :  { %v1442_v9 = vadd.f32 0.5, %v1440_v7  ;;  %v1445_v41 = vmul.f32 %v1441_v45, %v1378_v21 }
0x1733   :  { %v1444_v61 = vsel %vm78_vm3, %v2121_v60, %v1442_v9 }
0x1734   :  { %v1446_v13 = vmul.f32 %v1444_v61, %v1441_v45  ;;  %v2237_v45 = vmov 0.0|0.0  }
0x1735   :  { %1985 = vmatprep.subr.bf16.mxu0 %v2237_v45 }
0x1736   :  { %1448 = vrot.lane.b32.xlu1 %v1446_v13, %s2235_s14 }
0x17a8   :  { %v1449_v22 = vpop.permute.xlu1 %1448 }
0x17a9   :  { %v1451_v31 = vadd.f32 %v1449_v22, %v1445_v41 }
0x17ab   :  { %2122 = vtanh.f32 %v1451_v31 }
0x17b5   :  { %v2123_v24 = vpop.eup %2122 }
0x17b6   :  { %v1453_v17 = vmul.f32 %v2123_v24, %v1444_v61  ;;  %v1680_v24 = vld [vmem:[#allocation10 + $0x38] sm:$0xff] }
0x17b8   :  { %v1456_v32 = vpack.c.bf16 %v1453_v17, %v1453_v17 }
0x17ba   :  { %1458 = vrot.lane.b32.xlu0 %v1456_v32, %s2235_s14 }
0x182c   :  { %v1459_v23 = vpop.permute.xlu0 %1458 }
0x182d   :  { %1947 = vmatmul.mubr.msk.bf16.vlgmr.msra.gmra.mrb[32].mxu1 %vm331_vm4, %v1459_v23 }
0x182e   :  { %1610 = vmatpush1.bf16.msra.mxu1 %v2789_v19  ;;  %1641 = vmatprep.mubr.bf16.mxu1 %v2236_v34 }
0x182f   :  { %1611 = vmatprep.subr.bf16.mxu1 %v2791_v35 }
0x1832   :  { %1612 = vmatpush1.bf16.msra.mxu1 %v2796_v36 }
0x1833   :  { %1613 = vmatprep.subr.bf16.mxu1 %v2800_v2 }
0x1836   :  { %1614 = vmatpush1.bf16.msra.mxu1 %v2804_v38 }
0x1837   :  { %1615 = vmatprep.subr.bf16.mxu1 %v2808_v39 }
0x183a   :  { %1616 = vmatpush1.bf16.msra.mxu1 %v2812_v5 }
0x183b   :  { %1991 = vmatprep.subr.bf16.mxu1 %v2237_v45 }
0x1900   :  { %v1497_v33 = vpop.f32.mrb[32].mxu1 }
0x1901   :  { %v1504_v19 = vadd.f32 %v1497_v33, %v1454_v28  ;;  %v1499_v34 = vpop.f32.mrb[33].mxu1 }
0x1902   :  { %v1505_v35 = vadd.f32 %v1499_v34, %v1455_v43  ;;  %v1501_v36 = vpop.f32.mrb[34].mxu1 }
0x1903   :  { %v1506_v2 = vmul.f32 0.5, %v1504_v19  ;;  %v1502_v38 = vpop.f32.mrb[35].mxu1 }
0x1904   :  { %v1507_v39 = vmul.f32 0.5, %v1505_v35 }
0x1905   :  { %2124 = vtanh.f32 %v1506_v2 }
0x1906   :  { %v1509_v5 = vsel %vm78_vm3, %v1505_v35, %v1507_v39 }
0x1907   :  { %2126 = vtanh.f32 %v1509_v5 }
0x190f   :  { %v2125_v15 = vpop.eup %2124 }
0x1910   :  { %v1512_v37 = vmul.f32 0.5, %v2125_v15 }
0x1911   :  { %v2127_v20 = vpop.eup %2126 }
0x1912   :  { %v1513_v16 = vmul.f32 0.5, %v2127_v20  ;;  %v1514_v10 = vadd.f32 0.5, %v1512_v37 }
0x1914   :  { %v1515_v28 = vadd.f32 0.5, %v1513_v16  ;;  %v1518_v18 = vmul.f32 %v1514_v10, %v1451_v31  ;;  %v1679_v31 = vld [vmem:[#allocation10 + $0x30] sm:$0xff] }
0x1915   :  { %v1989_v17 = vpack.c.bf16 %v1680_v24, %v1679_v31 }
0x1916   :  { %v1517_v21 = vsel %vm78_vm3, %v2127_v20, %v1515_v28  ;;  %v1674_v28 = vld [vmem:[#allocation10 + $0x8] sm:$0xff] }
0x1917   :  { %v1519_v4 = vmul.f32 %v1517_v21, %v1514_v10  ;;  %v1675_v10 = vld [vmem:[#allocation10 + $0x10] sm:$0xff] }
0x1919   :  { %1521 = vrot.lane.b32.xlu1 %v1519_v4, %s2235_s14  ;;  %v1676_v4 = vld [vmem:[#allocation10 + $0x18] sm:$0xff] }
0x198b   :  { %v1522_v43 = vpop.permute.xlu1 %1521 }
0x198c   :  { %v1524_v29 = vadd.f32 %v1522_v43, %v1518_v18  ;;  %v1995_v18 = vpack.c.bf16 %v1676_v4, %v1675_v10 }
0x198e   :  { %2128 = vtanh.f32 %v1524_v29 }
0x1998   :  { %v2129_v42 = vpop.eup %2128 }
0x1999   :  { %v1526_v3 = vmul.f32 %v2129_v42, %v1517_v21 }
0x199b   :  { %v1529_v50 = vpack.c.bf16 %v1526_v3, %v1526_v3 }
0x199d   :  { %1531 = vrot.lane.b32.xlu0 %v1529_v50, %s2235_s14 }
0x1a0f   :  { %v1532_v48 = vpop.permute.xlu0 %1531 }
0x1a10   :  { %1948 = vmatmul.mubr.msk.bf16.vlgmr.msra.gmra.mrb[28].mxu0 %vm331_vm4, %v1532_v48  ;;  %v1952_v48 = vld [vmem:[#allocation10 + $0x40] ss:$0 sm:$0xff] }
0x1a11   :  { %1971 = vmatprep.mubr.msk.f32.mxu0 %vm2238_vm7, %v2234_v0 }
0x1ae3   :  { %v1570_v27 = vpop.f32.mrb[28].mxu0 }
0x1ae4   :  { %v1577_v14 = vadd.f32 %v1570_v27, %v1527_v8  ;;  %v1572_v46 = vpop.f32.mrb[29].mxu0 }
0x1ae5   :  { %v1578_v55 = vadd.f32 %v1572_v46, %v1528_v26  ;;  %v1574_v52 = vpop.f32.mrb[30].mxu0  ;;  %v1678_v26 = vld [vmem:[#allocation10 + $0x28] sm:$0xff] }
0x1ae6   :  { %v1579_v53 = vmul.f32 0.5, %v1577_v14  ;;  %v1575_v56 = vpop.f32.mrb[31].mxu0  ;;  %v1986_v61 = vpack.c.bf16 %v1678_v26, %v1677_v47 }
0x1ae7   :  { %v1580_v57 = vmul.f32 0.5, %v1578_v55 }
0x1ae8   :  { %2130 = vtanh.f32 %v1579_v53  ;;  %1987 = vmatpush3.bf16.msra.mxu0 %v1986_v61 }
0x1ae9   :  { %v1582_v59 = vsel %vm78_vm3, %v1578_v55, %v1580_v57  ;;  %1988 = vmatprep.subr.bf16.mxu0 %v2237_v45 }
0x1aea   :  { %2132 = vtanh.f32 %v1582_v59 }
0x1aec   :  { %1990 = vmatpush3.bf16.msra.mxu0 %v1989_v17 }
0x1af2   :  { %v2131_v60 = vpop.eup %2130 }
0x1af3   :  { %v1585_v63 = vmul.f32 0.5, %v2131_v60 }
0x1af4   :  { %v2133_v40 = vpop.eup %2132 }
0x1af5   :  { %v1586_v44 = vmul.f32 0.5, %v2133_v40  ;;  %v1587_v7 = vadd.f32 0.5, %v1585_v63 }
0x1af7   :  { %v1588_v8 = vadd.f32 0.5, %v1586_v44  ;;  %v1591_v13 = vmul.f32 %v1587_v7, %v1524_v29 }
0x1af9   :  { %v1590_v9 = vsel %vm78_vm3, %v2133_v40, %v1588_v8 }
0x1afa   :  { %v1592_v1 = vmul.f32 %v1590_v9, %v1587_v7 }
0x1afc   :  { %1594 = vrot.lane.b32.xlu1 %v1592_v1, %s2235_s14 }
0x1b6e   :  { %v1595_v41 = vpop.permute.xlu1 %1594 }
0x1b6f   :  { %v1597_v22 = vadd.f32 %v1595_v41, %v1591_v13 }
0x1b71   :  { %2134 = vtanh.f32 %v1597_v22 }
0x1b7b   :  { %v2135_v32 = vpop.eup %2134 }
0x1b7c   :  { %v1599_v23 = vmul.f32 %v2135_v32, %v1590_v9 }
0x1b7e   :  { %v1602_v33 = vpack.c.bf16 %v1599_v23, %v1599_v23 }
0x1b80   :  { %1604 = vrot.lane.b32.xlu0 %v1602_v33, %s2235_s14 }
0x1b84   :  { %1683 = vrot.lane.b32.xlu0 %v2821_v25, %s2231_s16 }
0x1bf2   :  { %v1605_v19 = vpop.permute.xlu0 %1604 }
0x1bf3   :  { %1949 = vmatmul.mubr.msk.bf16.vlgmr.msra.gmra.mrb[36].mxu1 %vm331_vm4, %v1605_v19 }
0x1bf4   :  { %1982 = vmatprep.mubr.msk.f32.mxu1 %vm2238_vm7, %v2234_v0 }
0x1bf6   :  { %v1684_v34 = vpop.permute.xlu0 %1683 }
0x1bf7   :  { %1972 = vmatmul.mubr.msk.f32.vlgmr.msra.gmra.mrb[32].mxu0 %vm277_vm5, %v1684_v34 }
0x1cc6   :  { %v1643_v35 = vpop.f32.mrb[36].mxu1 }
0x1cc7   :  { %v1650_v36 = vadd.f32 %v1643_v35, %v1600_v51  ;;  %v1645_v2 = vpop.f32.mrb[37].mxu1 }
0x1cc8   :  { %v1651_v25 = vadd.f32 %v1645_v2, %v1601_v30  ;;  %v1647_v38 = vpop.f32.mrb[38].mxu1  ;;  %v1673_v30 = vld [vmem:[#allocation10] sm:$0xff] }
0x1cc9   :  { %v1652_v39 = vmul.f32 0.5, %v1650_v36  ;;  %v1648_v0 = vpop.f32.mrb[39].mxu1  ;;  %v1992_v21 = vpack.c.bf16 %v1674_v28, %v1673_v30 }
0x1cca   :  { %v1653_v5 = vmul.f32 0.5, %v1651_v25  ;;  %v1753_v15 = vpop.f32.mrb[32].mxu0 }
0x1ccb   :  { %2136 = vtanh.f32 %v1652_v39  ;;  %v1973_v20 = vpop.f32.mrb[33].mxu0  ;;  %1993 = vmatpush3.bf16.msra.mxu1 %v1992_v21 }
0x1ccc   :  { %v1655_v11 = vsel %vm78_vm3, %v1651_v25, %v1653_v5  ;;  %1994 = vmatprep.subr.bf16.mxu1 %v2237_v45 }
0x1ccd   :  { %2138 = vtanh.f32 %v1655_v11 }
0x1ccf   :  { %1996 = vmatpush3.bf16.msra.mxu1 %v1995_v18 }
0x1cd5   :  { %v2137_v62 = vpop.eup %2136 }
0x1cd6   :  { %v1658_v51 = vmul.f32 0.5, %v2137_v62 }
0x1cd7   :  { %v2139_v49 = vpop.eup %2138 }
0x1cd8   :  { %v1659_v37 = vmul.f32 0.5, %v2139_v49  ;;  %v1660_v16 = vadd.f32 0.5, %v1658_v51 }
0x1cda   :  { %v1661_v12 = vadd.f32 0.5, %v1659_v37  ;;  %v1664_v43 = vmul.f32 %v1660_v16, %v1597_v22 }
0x1cdc   :  { %v1663_v58 = vsel %vm78_vm3, %v2139_v49, %v1661_v12 }
0x1cdd   :  { %v1665_v54 = vmul.f32 %v1663_v58, %v1660_v16 }
0x1cdf   :  { %1667 = vrot.lane.b32.xlu1 %v1665_v54, %s2235_s14 }
0x1d51   :  { %v1668_v29 = vpop.permute.xlu1 %1667 }
0x1d52   :  { %v1670_v42 = vadd.f32 %v1668_v29, %v1664_v43 }
0x1d54   :  { %2140 = vtanh.f32 %v1670_v42 }
0x1d5e   :  { %v2141_v3 = vpop.eup %2140 }
0x1d5f   :  { %v1672_v50 = vmul.f32 %v2141_v3, %v1663_v58 }
0x1d61   :  { %1758 = vrot.lane.b32.xlu1 %v1672_v50, %s2235_s14 }
0x1dd3   :  { %v1759_v6 = vpop.permute.xlu1 %1758 }
0x1dd4   :  { %1983 = vmatmul.mubr.msk.f32.vlgmr.msra.gmra.mrb[40].mxu1 %vm277_vm5, %v1759_v6 }
0x1ea7   :  { %v1828_v27 = vpop.f32.mrb[40].mxu1 }
0x1ea8   :  { %v1829_v14 = vadd.f32 %v1828_v27, %v1753_v15  ;;  %v1984_v46 = vpop.f32.mrb[41].mxu1 }
0x1eaa   :  { %v1836_v55 = vadd.f32 %v1952_v48, %v1829_v14 }
0x1eac   :  { %1837 = vst [vmem:[%s3001_s4] sm:$0xff] %v1836_v55 }
0x1ead   :  { %1842 = vsyncpa [#allocation5], 1 }
0x1eae   :  { %1843 = vsyncpa [#allocation9], 1 }
0x1eaf   :  { %1844 = vsyncpa [#allocation6], 1 }

</bundles_post_ra>
